<compile_context>
chip_gen: v7x
topology: tpu7x:2x2x1
jax: 0.10.0
libtpu: 0.0.40
codegen_flags: <defaults>
</compile_context>

<pallas_src>
import jax
import jax.numpy as jnp
from jax import lax
from jax.experimental import pallas as pl
from jax.experimental.pallas import tpu as pltpu

# ---- small, module-consistent configuration -------------------------------
ICH = 8            # 'ich' channel count (torch default 256, shrunk)
K = 3              # wavelet order k
DEPTH = 3          # number of MWT_CZ / FeedForward blocks (torch default 12)
L = 0              # decomposition levels (torch default 0 -> ns = 0)
B = 2
N = 16             # sequence length
D = ICH * K        # total_ch = 24
H = 2 * D          # FeedForward hidden dim (factor = 2) = 48
LAYER_SCALE = 1e-3
LN_EPS = 1e-5

FEAT = 128         # lane-padded feature width (TPU lane count)
assert ICH <= FEAT and D <= FEAT and H <= FEAT

NMAT = 2 + 3 * DEPTH    # Wk, (T0, W1, W2) per layer, Wc
NVEC = 2 + 6 * DEPTH    # bk, (t0b, ln_g, ln_b, b1, b2, rescale) per layer, bc

_INV_SQRT2 = 0.7071067811865475


def _gelu_exact(x):
    # matches torch nn.GELU() default (erf formulation)
    return 0.5 * x * (1.0 + lax.erf(x * _INV_SQRT2))


# ---------------------------- Pallas kernel --------------------------------
def mwt1d_kernel(x_ref, wmat_ref, wvec_ref, o_ref):
    rows = x_ref.shape[0]
    x = x_ref[...]                                            # (T, 128), lanes >= ICH are zero

    # Lk: Linear(ich -> D), embedded in a (128,128) zero-padded slab
    h = jnp.dot(x, wmat_ref[0], preferred_element_type=jnp.float32) + wvec_ref[0:1, :]

    # LayerNorm lane-validity mask (real feature lanes are [0, D)); hoisted.
    lane = lax.broadcasted_iota(jnp.int32, (rows, FEAT), 1)
    ln_mask = lane < D
    inv_d = 1.0 / D

    # TODO(synk): at real depth (12) fold this loop into a grid axis /
    # lax.fori_loop to bound vreg live ranges; static unroll is fine at DEPTH=3.
    for i in range(DEPTH):
        mb = 1 + 3 * i
        vb = 1 + 6 * i

        # MWT_CZ1d with ns=0 == T0 Linear(k,k) on the k axis, as a block-diag
        # (D,D) matmul embedded in a (128,128) slab.
        xx = (jnp.dot(h, wmat_ref[mb + 0], preferred_element_type=jnp.float32)
              + wvec_ref[vb + 0:vb + 1, :])

        # FeedForward: LayerNorm -> Linear(D,2D) -> GELU -> Linear(2D,D)
        mu = jnp.sum(xx, axis=-1, keepdims=True) * inv_d       # pad lanes are zero
        dcen = jnp.where(ln_mask, xx - mu, 0.0)
        var = jnp.sum(dcen * dcen, axis=-1, keepdims=True) * inv_d
        xn = dcen * lax.rsqrt(var + LN_EPS)
        xn = xn * wvec_ref[vb + 1:vb + 2, :] + wvec_ref[vb + 2:vb + 3, :]

        hh = (jnp.dot(xn, wmat_ref[mb + 1], preferred_element_type=jnp.float32)
              + wvec_ref[vb + 3:vb + 4, :])
        hh = _gelu_exact(hh)
        yy = (jnp.dot(hh, wmat_ref[mb + 2], preferred_element_type=jnp.float32)
              + wvec_ref[vb + 4:vb + 5, :])

        # residual with layer-scale rescale[i] (zero in padded lanes)
        h = h + wvec_ref[vb + 5:vb + 6, :] * yy

    # Lc0: Linear(D -> ich), zero-padded to 128 output lanes -> unmasked store
    o = (jnp.dot(h, wmat_ref[1 + 3 * DEPTH], preferred_element_type=jnp.float32)
         + wvec_ref[1 + 6 * DEPTH:2 + 6 * DEPTH, :])
    o_ref[...] = o.astype(o_ref.dtype)


# ------------------------------ parameters ---------------------------------
def init_params(key):
    ks = jax.random.split(key, 12)

    def w(k, shape, scale=0.05):
        return jax.random.normal(k, shape, jnp.float32) * scale

    return {
        'Wk': w(ks[0], (ICH, D)),              # Lk Linear, (in, out) layout
        'bk': w(ks[1], (D,)),
        'T0W': w(ks[2], (DEPTH, K, K)),        # T0 Linear(k,k), torch (out, in)
        'T0b': w(ks[3], (DEPTH, K)),
        'lng': 1.0 + w(ks[4], (DEPTH, D), 0.1),    # LayerNorm gamma
        'lnb': w(ks[5], (DEPTH, D), 0.1),          # LayerNorm beta
        'W1': w(ks[6], (DEPTH, D, H)),
        'b1': w(ks[7], (DEPTH, H)),
        'W2': w(ks[8], (DEPTH, H, D)),
        'b2': w(ks[9], (DEPTH, D)),
        'rescale': jnp.full((DEPTH, D), LAYER_SCALE, jnp.float32),
        'Wc': w(ks[10], (D, ICH)),
        'bc': w(ks[11], (ICH,)),
    }


def pack_params(params):
    """One-time packing: 13 tensors -> one (NMAT,128,128) and one (NVEC,128) slab,
    zero-padded so every kernel matmul/store is lane-dense."""
    wmat = jnp.zeros((NMAT, FEAT, FEAT), jnp.float32)
    wvec = jnp.zeros((NVEC, FEAT), jnp.float32)

    wmat = wmat.at[0, :ICH, :D].set(params['Wk'])
    wvec = wvec.at[0, :D].set(params['bk'])

    eye_c = jnp.eye(ICH, dtype=jnp.float32)
    for i in range(DEPTH):
        mb = 1 + 3 * i
        vb = 1 + 6 * i
        # block-diagonal expansion of T0: y = x @ kron(I_ich, W_T0^T)
        t0_big = jnp.kron(eye_c, params['T0W'][i].T)           # (D, D)
        wmat = wmat.at[mb + 0, :D, :D].set(t0_big)
        wmat = wmat.at[mb + 1, :D, :H].set(params['W1'][i])
        wmat = wmat.at[mb + 2, :H, :D].set(params['W2'][i])
        wvec = wvec.at[vb + 0, :D].set(jnp.tile(params['T0b'][i], ICH))
        wvec = wvec.at[vb + 1, :D].set(params['lng'][i])
        wvec = wvec.at[vb + 2, :D].set(params['lnb'][i])
        wvec = wvec.at[vb + 3, :H].set(params['b1'][i])
        wvec = wvec.at[vb + 4, :D].set(params['b2'][i])
        wvec = wvec.at[vb + 5, :D].set(params['rescale'][i])

    wmat = wmat.at[1 + 3 * DEPTH, :D, :ICH].set(params['Wc'])
    wvec = wvec.at[1 + 6 * DEPTH, :ICH].set(params['bc'])
    return wmat, wvec


# ------------------------------- wrapper ------------------------------------
def mwt1d_forward(x_bcn, wmat, wvec):
    Bv, Cv, Nv = x_bcn.shape
    T = Bv * Nv
    x2 = jnp.transpose(x_bcn, (0, 2, 1)).reshape(T, Cv)        # (B*N, ich)

    # pad tokens to a sublane multiple and channels to the 128-lane width
    Tp = ((T + 7) // 8) * 8
    xp = jnp.zeros((Tp, FEAT), jnp.float32).at[:T, :Cv].set(x2)

    out = pl.pallas_call(
        mwt1d_kernel,
        out_shape=jax.ShapeDtypeStruct((Tp, FEAT), jnp.float32),
        grid=(1,),                                             # whole slab fits VMEM
        in_specs=[
            pl.BlockSpec((Tp, FEAT), lambda i: (i, 0)),
            pl.BlockSpec((NMAT, FEAT, FEAT), lambda i: (0, 0, 0)),
            pl.BlockSpec((NVEC, FEAT), lambda i: (0, 0)),
        ],
        out_specs=pl.BlockSpec((Tp, FEAT), lambda i: (i, 0)),
        compiler_params=pltpu.CompilerParams(dimension_semantics=("parallel",)),
    )(xp, wmat, wvec)

    out = out[:T, :Cv]
    return jnp.transpose(out.reshape(Bv, Nv, Cv), (0, 2, 1))   # back to (B, ich, N)


# --------------------------- pure-JAX reference ------------------------------
def mwt1d_reference(x_bcn, params):
    Bv, Cv, Nv = x_bcn.shape
    x = jnp.transpose(x_bcn, (0, 2, 1))                        # (B, N, ich)
    h = x @ params['Wk'] + params['bk']                        # (B, N, D)
    for i in range(DEPTH):
        xk = h.reshape(Bv, Nv, ICH, K)
        xx = jnp.einsum('bnck,jk->bncj', xk, params['T0W'][i]) + params['T0b'][i]
        xx = xx.reshape(Bv, Nv, D)
        mu = jnp.mean(xx, axis=-1, keepdims=True)
        var = jnp.mean(jnp.square(xx - mu), axis=-1, keepdims=True)
        xn = (xx - mu) / jnp.sqrt(var + LN_EPS)
        xn = xn * params['lng'][i] + params['lnb'][i]
        hh = _gelu_exact(xn @ params['W1'][i] + params['b1'][i])
        yy = hh @ params['W2'][i] + params['b2'][i]
        h = h + params['rescale'][i] * yy
    out = h @ params['Wc'] + params['bc']
    return jnp.transpose(out, (0, 2, 1))


if __name__ == "__main__":
    key = jax.random.PRNGKey(0)
    kp, kx = jax.random.split(key)
    params = init_params(kp)
    wmat, wvec = pack_params(params)                           # one-time packing
    x = jax.random.normal(kx, (B, ICH, N), jnp.float32)        # (B, ich, N), NCW like torch

    fwd = jax.jit(mwt1d_forward)
    y = fwd(x, wmat, wvec)
    y = jax.block_until_ready(y)

    y_ref = mwt1d_reference(x, params)
    assert y.shape == (B, ICH, N)
    err = float(jnp.max(jnp.abs(y - y_ref)))
    assert jnp.allclose(y, y_ref, atol=2e-5, rtol=2e-5), err

    print("KERNEL_OK")
</pallas_src>

<mosaic_0001>
module attributes {stable_mosaic.version = 11 : i64} {
  func.func @mwt1d_kernel(%arg0: i32, %arg1: memref<32x128xf32, #tpu.memory_space<vmem>>, %arg2: memref<11x128x128xf32, #tpu.memory_space<vmem>>, %arg3: memref<20x128xf32, #tpu.memory_space<vmem>>, %arg4: memref<32x128xf32, #tpu.memory_space<vmem>>) attributes {dimension_semantics = [#tpu.dimension_semantics<parallel>], iteration_bounds = array<i64: 1>, scalar_prefetch = 0 : i64, scratch_operands = 0 : i64, tpu.core_type = #tpu.core_type<tc>, window_params = [{transform_indices = @transform_0, window_bounds = array<i64: 32, 128>}, {pipeline_mode = #tpu.pipeline_mode<synchronous>, transform_indices = @transform_1, window_bounds = array<i64: 11, 128, 128>}, {pipeline_mode = #tpu.pipeline_mode<synchronous>, transform_indices = @transform_2, window_bounds = array<i64: 20, 128>}, {transform_indices = @transform_3, window_bounds = array<i64: 32, 128>}]} {
    %c0 = arith.constant 0 : index
    %c0_0 = arith.constant 0 : index
    %0 = vector.load %arg1[%c0, %c0_0] : memref<32x128xf32, #tpu.memory_space<vmem>>, vector<32x128xf32>
    %c0_1 = arith.constant 0 : index
    %c0_2 = arith.constant 0 : index
    %c0_3 = arith.constant 0 : index
    %1 = vector.load %arg2[%c0_1, %c0_2, %c0_3] : memref<11x128x128xf32, #tpu.memory_space<vmem>>, vector<1x128x128xf32>
    %2 = vector.shape_cast %1 : vector<1x128x128xf32> to vector<128x128xf32>
    %cst = arith.constant dense<0.000000e+00> : vector<32x128xf32>
    %3 = tpu.matmul %0, %2, %cst {dimension_numbers = #tpu.dot_dimension_numbers<[1], [0], [0], [1], [0, 0, 1, 1], [], []>} : vector<32x128xf32>, vector<128x128xf32>, vector<32x128xf32> -> vector<32x128xf32>
    %c0_4 = arith.constant 0 : index
    %c0_5 = arith.constant 0 : index
    %4 = vector.load %arg3[%c0_4, %c0_5] : memref<20x128xf32, #tpu.memory_space<vmem>>, vector<1x128xf32>
    %5 = vector.broadcast %4 : vector<1x128xf32> to vector<32x128xf32>
    %6 = arith.addf %3, %5 : vector<32x128xf32>
    %7 = tpu.iota {dimensions = array<i32: 1>} : vector<32x128xi32>
    %c24_i32 = arith.constant 24 : i32
    %8 = vector.broadcast %c24_i32 : i32 to vector<32x128xi32>
    %9 = arith.cmpi slt, %7, %8 : vector<32x128xi32>
    %c1 = arith.constant 1 : index
    %c0_6 = arith.constant 0 : index
    %c0_7 = arith.constant 0 : index
    %10 = vector.load %arg2[%c1, %c0_6, %c0_7] : memref<11x128x128xf32, #tpu.memory_space<vmem>>, vector<1x128x128xf32>
    %11 = vector.shape_cast %10 : vector<1x128x128xf32> to vector<128x128xf32>
    %cst_8 = arith.constant dense<0.000000e+00> : vector<32x128xf32>
    %12 = tpu.matmul %6, %11, %cst_8 {dimension_numbers = #tpu.dot_dimension_numbers<[1], [0], [0], [1], [0, 0, 1, 1], [], []>} : vector<32x128xf32>, vector<128x128xf32>, vector<32x128xf32> -> vector<32x128xf32>
    %c1_9 = arith.constant 1 : index
    %c0_10 = arith.constant 0 : index
    %13 = vector.load %arg3[%c1_9, %c0_10] : memref<20x128xf32, #tpu.memory_space<vmem>>, vector<1x128xf32>
    %14 = vector.broadcast %13 : vector<1x128xf32> to vector<32x128xf32>
    %15 = arith.addf %12, %14 : vector<32x128xf32>
    %cst_11 = arith.constant dense<0.000000e+00> : vector<32xf32>
    %16 = vector.multi_reduction <add>, %15, %cst_11 [1] : vector<32x128xf32> to vector<32xf32>
    %17 = vector.shape_cast %16 : vector<32xf32> to vector<32x1xf32>
    %cst_12 = arith.constant 0.0416666679 : f32
    %18 = vector.broadcast %cst_12 : f32 to vector<32x1xf32>
    %19 = arith.mulf %17, %18 : vector<32x1xf32>
    %20 = vector.broadcast %19 : vector<32x1xf32> to vector<32x128xf32>
    %21 = arith.subf %15, %20 : vector<32x128xf32>
    %cst_13 = arith.constant 0.000000e+00 : f32
    %22 = vector.broadcast %cst_13 : f32 to vector<32x128xf32>
    %23 = arith.select %9, %21, %22 : vector<32x128xi1>, vector<32x128xf32>
    %24 = arith.mulf %23, %23 : vector<32x128xf32>
    %cst_14 = arith.constant dense<0.000000e+00> : vector<32xf32>
    %25 = vector.multi_reduction <add>, %24, %cst_14 [1] : vector<32x128xf32> to vector<32xf32>
    %26 = vector.shape_cast %25 : vector<32xf32> to vector<32x1xf32>
    %cst_15 = arith.constant 0.0416666679 : f32
    %27 = vector.broadcast %cst_15 : f32 to vector<32x1xf32>
    %28 = arith.mulf %26, %27 : vector<32x1xf32>
    %cst_16 = arith.constant 9.99999974E-6 : f32
    %29 = vector.broadcast %cst_16 : f32 to vector<32x1xf32>
    %30 = arith.addf %28, %29 : vector<32x1xf32>
    %31 = math.rsqrt %30 : vector<32x1xf32>
    %32 = vector.broadcast %31 : vector<32x1xf32> to vector<32x128xf32>
    %33 = arith.mulf %23, %32 : vector<32x128xf32>
    %c2 = arith.constant 2 : index
    %c0_17 = arith.constant 0 : index
    %34 = vector.load %arg3[%c2, %c0_17] : memref<20x128xf32, #tpu.memory_space<vmem>>, vector<1x128xf32>
    %35 = vector.broadcast %34 : vector<1x128xf32> to vector<32x128xf32>
    %36 = arith.mulf %33, %35 : vector<32x128xf32>
    %c3 = arith.constant 3 : index
    %c0_18 = arith.constant 0 : index
    %37 = vector.load %arg3[%c3, %c0_18] : memref<20x128xf32, #tpu.memory_space<vmem>>, vector<1x128xf32>
    %38 = vector.broadcast %37 : vector<1x128xf32> to vector<32x128xf32>
    %39 = arith.addf %36, %38 : vector<32x128xf32>
    %c2_19 = arith.constant 2 : index
    %c0_20 = arith.constant 0 : index
    %c0_21 = arith.constant 0 : index
    %40 = vector.load %arg2[%c2_19, %c0_20, %c0_21] : memref<11x128x128xf32, #tpu.memory_space<vmem>>, vector<1x128x128xf32>
    %41 = vector.shape_cast %40 : vector<1x128x128xf32> to vector<128x128xf32>
    %cst_22 = arith.constant dense<0.000000e+00> : vector<32x128xf32>
    %42 = tpu.matmul %39, %41, %cst_22 {dimension_numbers = #tpu.dot_dimension_numbers<[1], [0], [0], [1], [0, 0, 1, 1], [], []>} : vector<32x128xf32>, vector<128x128xf32>, vector<32x128xf32> -> vector<32x128xf32>
    %c4 = arith.constant 4 : index
    %c0_23 = arith.constant 0 : index
    %43 = vector.load %arg3[%c4, %c0_23] : memref<20x128xf32, #tpu.memory_space<vmem>>, vector<1x128xf32>
    %44 = vector.broadcast %43 : vector<1x128xf32> to vector<32x128xf32>
    %45 = arith.addf %42, %44 : vector<32x128xf32>
    %cst_24 = arith.constant 5.000000e-01 : f32
    %46 = vector.broadcast %cst_24 : f32 to vector<32x128xf32>
    %47 = arith.mulf %46, %45 : vector<32x128xf32>
    %cst_25 = arith.constant 0.707106769 : f32
    %48 = vector.broadcast %cst_25 : f32 to vector<32x128xf32>
    %49 = arith.mulf %45, %48 : vector<32x128xf32>
    %50 = math.erf %49 : vector<32x128xf32>
    %cst_26 = arith.constant 1.000000e+00 : f32
    %51 = vector.broadcast %cst_26 : f32 to vector<32x128xf32>
    %52 = arith.addf %51, %50 : vector<32x128xf32>
    %53 = arith.mulf %47, %52 : vector<32x128xf32>
    %c3_27 = arith.constant 3 : index
    %c0_28 = arith.constant 0 : index
    %c0_29 = arith.constant 0 : index
    %54 = vector.load %arg2[%c3_27, %c0_28, %c0_29] : memref<11x128x128xf32, #tpu.memory_space<vmem>>, vector<1x128x128xf32>
    %55 = vector.shape_cast %54 : vector<1x128x128xf32> to vector<128x128xf32>
    %cst_30 = arith.constant dense<0.000000e+00> : vector<32x128xf32>
    %56 = tpu.matmul %53, %55, %cst_30 {dimension_numbers = #tpu.dot_dimension_numbers<[1], [0], [0], [1], [0, 0, 1, 1], [], []>} : vector<32x128xf32>, vector<128x128xf32>, vector<32x128xf32> -> vector<32x128xf32>
    %c5 = arith.constant 5 : index
    %c0_31 = arith.constant 0 : index
    %57 = vector.load %arg3[%c5, %c0_31] : memref<20x128xf32, #tpu.memory_space<vmem>>, vector<1x128xf32>
    %58 = vector.broadcast %57 : vector<1x128xf32> to vector<32x128xf32>
    %59 = arith.addf %56, %58 : vector<32x128xf32>
    %c6 = arith.constant 6 : index
    %c0_32 = arith.constant 0 : index
    %60 = vector.load %arg3[%c6, %c0_32] : memref<20x128xf32, #tpu.memory_space<vmem>>, vector<1x128xf32>
    %61 = vector.broadcast %60 : vector<1x128xf32> to vector<32x128xf32>
    %62 = arith.mulf %61, %59 : vector<32x128xf32>
    %63 = arith.addf %6, %62 : vector<32x128xf32>
    %c4_33 = arith.constant 4 : index
    %c0_34 = arith.constant 0 : index
    %c0_35 = arith.constant 0 : index
    %64 = vector.load %arg2[%c4_33, %c0_34, %c0_35] : memref<11x128x128xf32, #tpu.memory_space<vmem>>, vector<1x128x128xf32>
    %65 = vector.shape_cast %64 : vector<1x128x128xf32> to vector<128x128xf32>
    %cst_36 = arith.constant dense<0.000000e+00> : vector<32x128xf32>
    %66 = tpu.matmul %63, %65, %cst_36 {dimension_numbers = #tpu.dot_dimension_numbers<[1], [0], [0], [1], [0, 0, 1, 1], [], []>} : vector<32x128xf32>, vector<128x128xf32>, vector<32x128xf32> -> vector<32x128xf32>
    %c7 = arith.constant 7 : index
    %c0_37 = arith.constant 0 : index
    %67 = vector.load %arg3[%c7, %c0_37] : memref<20x128xf32, #tpu.memory_space<vmem>>, vector<1x128xf32>
    %68 = vector.broadcast %67 : vector<1x128xf32> to vector<32x128xf32>
    %69 = arith.addf %66, %68 : vector<32x128xf32>
    %cst_38 = arith.constant dense<0.000000e+00> : vector<32xf32>
    %70 = vector.multi_reduction <add>, %69, %cst_38 [1] : vector<32x128xf32> to vector<32xf32>
    %71 = vector.shape_cast %70 : vector<32xf32> to vector<32x1xf32>
    %cst_39 = arith.constant 0.0416666679 : f32
    %72 = vector.broadcast %cst_39 : f32 to vector<32x1xf32>
    %73 = arith.mulf %71, %72 : vector<32x1xf32>
    %74 = vector.broadcast %73 : vector<32x1xf32> to vector<32x128xf32>
    %75 = arith.subf %69, %74 : vector<32x128xf32>
    %cst_40 = arith.constant 0.000000e+00 : f32
    %76 = vector.broadcast %cst_40 : f32 to vector<32x128xf32>
    %77 = arith.select %9, %75, %76 : vector<32x128xi1>, vector<32x128xf32>
    %78 = arith.mulf %77, %77 : vector<32x128xf32>
    %cst_41 = arith.constant dense<0.000000e+00> : vector<32xf32>
    %79 = vector.multi_reduction <add>, %78, %cst_41 [1] : vector<32x128xf32> to vector<32xf32>
    %80 = vector.shape_cast %79 : vector<32xf32> to vector<32x1xf32>
    %cst_42 = arith.constant 0.0416666679 : f32
    %81 = vector.broadcast %cst_42 : f32 to vector<32x1xf32>
    %82 = arith.mulf %80, %81 : vector<32x1xf32>
    %cst_43 = arith.constant 9.99999974E-6 : f32
    %83 = vector.broadcast %cst_43 : f32 to vector<32x1xf32>
    %84 = arith.addf %82, %83 : vector<32x1xf32>
    %85 = math.rsqrt %84 : vector<32x1xf32>
    %86 = vector.broadcast %85 : vector<32x1xf32> to vector<32x128xf32>
    %87 = arith.mulf %77, %86 : vector<32x128xf32>
    %c8 = arith.constant 8 : index
    %c0_44 = arith.constant 0 : index
    %88 = vector.load %arg3[%c8, %c0_44] : memref<20x128xf32, #tpu.memory_space<vmem>>, vector<1x128xf32>
    %89 = vector.broadcast %88 : vector<1x128xf32> to vector<32x128xf32>
    %90 = arith.mulf %87, %89 : vector<32x128xf32>
    %c9 = arith.constant 9 : index
    %c0_45 = arith.constant 0 : index
    %91 = vector.load %arg3[%c9, %c0_45] : memref<20x128xf32, #tpu.memory_space<vmem>>, vector<1x128xf32>
    %92 = vector.broadcast %91 : vector<1x128xf32> to vector<32x128xf32>
    %93 = arith.addf %90, %92 : vector<32x128xf32>
    %c5_46 = arith.constant 5 : index
    %c0_47 = arith.constant 0 : index
    %c0_48 = arith.constant 0 : index
    %94 = vector.load %arg2[%c5_46, %c0_47, %c0_48] : memref<11x128x128xf32, #tpu.memory_space<vmem>>, vector<1x128x128xf32>
    %95 = vector.shape_cast %94 : vector<1x128x128xf32> to vector<128x128xf32>
    %cst_49 = arith.constant dense<0.000000e+00> : vector<32x128xf32>
    %96 = tpu.matmul %93, %95, %cst_49 {dimension_numbers = #tpu.dot_dimension_numbers<[1], [0], [0], [1], [0, 0, 1, 1], [], []>} : vector<32x128xf32>, vector<128x128xf32>, vector<32x128xf32> -> vector<32x128xf32>
    %c10 = arith.constant 10 : index
    %c0_50 = arith.constant 0 : index
    %97 = vector.load %arg3[%c10, %c0_50] : memref<20x128xf32, #tpu.memory_space<vmem>>, vector<1x128xf32>
    %98 = vector.broadcast %97 : vector<1x128xf32> to vector<32x128xf32>
    %99 = arith.addf %96, %98 : vector<32x128xf32>
    %cst_51 = arith.constant 5.000000e-01 : f32
    %100 = vector.broadcast %cst_51 : f32 to vector<32x128xf32>
    %101 = arith.mulf %100, %99 : vector<32x128xf32>
    %cst_52 = arith.constant 0.707106769 : f32
    %102 = vector.broadcast %cst_52 : f32 to vector<32x128xf32>
    %103 = arith.mulf %99, %102 : vector<32x128xf32>
    %104 = math.erf %103 : vector<32x128xf32>
    %cst_53 = arith.constant 1.000000e+00 : f32
    %105 = vector.broadcast %cst_53 : f32 to vector<32x128xf32>
    %106 = arith.addf %105, %104 : vector<32x128xf32>
    %107 = arith.mulf %101, %106 : vector<32x128xf32>
    %c6_54 = arith.constant 6 : index
    %c0_55 = arith.constant 0 : index
    %c0_56 = arith.constant 0 : index
    %108 = vector.load %arg2[%c6_54, %c0_55, %c0_56] : memref<11x128x128xf32, #tpu.memory_space<vmem>>, vector<1x128x128xf32>
    %109 = vector.shape_cast %108 : vector<1x128x128xf32> to vector<128x128xf32>
    %cst_57 = arith.constant dense<0.000000e+00> : vector<32x128xf32>
    %110 = tpu.matmul %107, %109, %cst_57 {dimension_numbers = #tpu.dot_dimension_numbers<[1], [0], [0], [1], [0, 0, 1, 1], [], []>} : vector<32x128xf32>, vector<128x128xf32>, vector<32x128xf32> -> vector<32x128xf32>
    %c11 = arith.constant 11 : index
    %c0_58 = arith.constant 0 : index
    %111 = vector.load %arg3[%c11, %c0_58] : memref<20x128xf32, #tpu.memory_space<vmem>>, vector<1x128xf32>
    %112 = vector.broadcast %111 : vector<1x128xf32> to vector<32x128xf32>
    %113 = arith.addf %110, %112 : vector<32x128xf32>
    %c12 = arith.constant 12 : index
    %c0_59 = arith.constant 0 : index
    %114 = vector.load %arg3[%c12, %c0_59] : memref<20x128xf32, #tpu.memory_space<vmem>>, vector<1x128xf32>
    %115 = vector.broadcast %114 : vector<1x128xf32> to vector<32x128xf32>
    %116 = arith.mulf %115, %113 : vector<32x128xf32>
    %117 = arith.addf %63, %116 : vector<32x128xf32>
    %c7_60 = arith.constant 7 : index
    %c0_61 = arith.constant 0 : index
    %c0_62 = arith.constant 0 : index
    %118 = vector.load %arg2[%c7_60, %c0_61, %c0_62] : memref<11x128x128xf32, #tpu.memory_space<vmem>>, vector<1x128x128xf32>
    %119 = vector.shape_cast %118 : vector<1x128x128xf32> to vector<128x128xf32>
    %cst_63 = arith.constant dense<0.000000e+00> : vector<32x128xf32>
    %120 = tpu.matmul %117, %119, %cst_63 {dimension_numbers = #tpu.dot_dimension_numbers<[1], [0], [0], [1], [0, 0, 1, 1], [], []>} : vector<32x128xf32>, vector<128x128xf32>, vector<32x128xf32> -> vector<32x128xf32>
    %c13 = arith.constant 13 : index
    %c0_64 = arith.constant 0 : index
    %121 = vector.load %arg3[%c13, %c0_64] : memref<20x128xf32, #tpu.memory_space<vmem>>, vector<1x128xf32>
    %122 = vector.broadcast %121 : vector<1x128xf32> to vector<32x128xf32>
    %123 = arith.addf %120, %122 : vector<32x128xf32>
    %cst_65 = arith.constant dense<0.000000e+00> : vector<32xf32>
    %124 = vector.multi_reduction <add>, %123, %cst_65 [1] : vector<32x128xf32> to vector<32xf32>
    %125 = vector.shape_cast %124 : vector<32xf32> to vector<32x1xf32>
    %cst_66 = arith.constant 0.0416666679 : f32
    %126 = vector.broadcast %cst_66 : f32 to vector<32x1xf32>
    %127 = arith.mulf %125, %126 : vector<32x1xf32>
    %128 = vector.broadcast %127 : vector<32x1xf32> to vector<32x128xf32>
    %129 = arith.subf %123, %128 : vector<32x128xf32>
    %cst_67 = arith.constant 0.000000e+00 : f32
    %130 = vector.broadcast %cst_67 : f32 to vector<32x128xf32>
    %131 = arith.select %9, %129, %130 : vector<32x128xi1>, vector<32x128xf32>
    %132 = arith.mulf %131, %131 : vector<32x128xf32>
    %cst_68 = arith.constant dense<0.000000e+00> : vector<32xf32>
    %133 = vector.multi_reduction <add>, %132, %cst_68 [1] : vector<32x128xf32> to vector<32xf32>
    %134 = vector.shape_cast %133 : vector<32xf32> to vector<32x1xf32>
    %cst_69 = arith.constant 0.0416666679 : f32
    %135 = vector.broadcast %cst_69 : f32 to vector<32x1xf32>
    %136 = arith.mulf %134, %135 : vector<32x1xf32>
    %cst_70 = arith.constant 9.99999974E-6 : f32
    %137 = vector.broadcast %cst_70 : f32 to vector<32x1xf32>
    %138 = arith.addf %136, %137 : vector<32x1xf32>
    %139 = math.rsqrt %138 : vector<32x1xf32>
    %140 = vector.broadcast %139 : vector<32x1xf32> to vector<32x128xf32>
    %141 = arith.mulf %131, %140 : vector<32x128xf32>
    %c14 = arith.constant 14 : index
    %c0_71 = arith.constant 0 : index
    %142 = vector.load %arg3[%c14, %c0_71] : memref<20x128xf32, #tpu.memory_space<vmem>>, vector<1x128xf32>
    %143 = vector.broadcast %142 : vector<1x128xf32> to vector<32x128xf32>
    %144 = arith.mulf %141, %143 : vector<32x128xf32>
    %c15 = arith.constant 15 : index
    %c0_72 = arith.constant 0 : index
    %145 = vector.load %arg3[%c15, %c0_72] : memref<20x128xf32, #tpu.memory_space<vmem>>, vector<1x128xf32>
    %146 = vector.broadcast %145 : vector<1x128xf32> to vector<32x128xf32>
    %147 = arith.addf %144, %146 : vector<32x128xf32>
    %c8_73 = arith.constant 8 : index
    %c0_74 = arith.constant 0 : index
    %c0_75 = arith.constant 0 : index
    %148 = vector.load %arg2[%c8_73, %c0_74, %c0_75] : memref<11x128x128xf32, #tpu.memory_space<vmem>>, vector<1x128x128xf32>
    %149 = vector.shape_cast %148 : vector<1x128x128xf32> to vector<128x128xf32>
    %cst_76 = arith.constant dense<0.000000e+00> : vector<32x128xf32>
    %150 = tpu.matmul %147, %149, %cst_76 {dimension_numbers = #tpu.dot_dimension_numbers<[1], [0], [0], [1], [0, 0, 1, 1], [], []>} : vector<32x128xf32>, vector<128x128xf32>, vector<32x128xf32> -> vector<32x128xf32>
    %c16 = arith.constant 16 : index
    %c0_77 = arith.constant 0 : index
    %151 = vector.load %arg3[%c16, %c0_77] : memref<20x128xf32, #tpu.memory_space<vmem>>, vector<1x128xf32>
    %152 = vector.broadcast %151 : vector<1x128xf32> to vector<32x128xf32>
    %153 = arith.addf %150, %152 : vector<32x128xf32>
    %cst_78 = arith.constant 5.000000e-01 : f32
    %154 = vector.broadcast %cst_78 : f32 to vector<32x128xf32>
    %155 = arith.mulf %154, %153 : vector<32x128xf32>
    %cst_79 = arith.constant 0.707106769 : f32
    %156 = vector.broadcast %cst_79 : f32 to vector<32x128xf32>
    %157 = arith.mulf %153, %156 : vector<32x128xf32>
    %158 = math.erf %157 : vector<32x128xf32>
    %cst_80 = arith.constant 1.000000e+00 : f32
    %159 = vector.broadcast %cst_80 : f32 to vector<32x128xf32>
    %160 = arith.addf %159, %158 : vector<32x128xf32>
    %161 = arith.mulf %155, %160 : vector<32x128xf32>
    %c9_81 = arith.constant 9 : index
    %c0_82 = arith.constant 0 : index
    %c0_83 = arith.constant 0 : index
    %162 = vector.load %arg2[%c9_81, %c0_82, %c0_83] : memref<11x128x128xf32, #tpu.memory_space<vmem>>, vector<1x128x128xf32>
    %163 = vector.shape_cast %162 : vector<1x128x128xf32> to vector<128x128xf32>
    %cst_84 = arith.constant dense<0.000000e+00> : vector<32x128xf32>
    %164 = tpu.matmul %161, %163, %cst_84 {dimension_numbers = #tpu.dot_dimension_numbers<[1], [0], [0], [1], [0, 0, 1, 1], [], []>} : vector<32x128xf32>, vector<128x128xf32>, vector<32x128xf32> -> vector<32x128xf32>
    %c17 = arith.constant 17 : index
    %c0_85 = arith.constant 0 : index
    %165 = vector.load %arg3[%c17, %c0_85] : memref<20x128xf32, #tpu.memory_space<vmem>>, vector<1x128xf32>
    %166 = vector.broadcast %165 : vector<1x128xf32> to vector<32x128xf32>
    %167 = arith.addf %164, %166 : vector<32x128xf32>
    %c18 = arith.constant 18 : index
    %c0_86 = arith.constant 0 : index
    %168 = vector.load %arg3[%c18, %c0_86] : memref<20x128xf32, #tpu.memory_space<vmem>>, vector<1x128xf32>
    %169 = vector.broadcast %168 : vector<1x128xf32> to vector<32x128xf32>
    %170 = arith.mulf %169, %167 : vector<32x128xf32>
    %171 = arith.addf %117, %170 : vector<32x128xf32>
    %c10_87 = arith.constant 10 : index
    %c0_88 = arith.constant 0 : index
    %c0_89 = arith.constant 0 : index
    %172 = vector.load %arg2[%c10_87, %c0_88, %c0_89] : memref<11x128x128xf32, #tpu.memory_space<vmem>>, vector<1x128x128xf32>
    %173 = vector.shape_cast %172 : vector<1x128x128xf32> to vector<128x128xf32>
    %cst_90 = arith.constant dense<0.000000e+00> : vector<32x128xf32>
    %174 = tpu.matmul %171, %173, %cst_90 {dimension_numbers = #tpu.dot_dimension_numbers<[1], [0], [0], [1], [0, 0, 1, 1], [], []>} : vector<32x128xf32>, vector<128x128xf32>, vector<32x128xf32> -> vector<32x128xf32>
    %c19 = arith.constant 19 : index
    %c0_91 = arith.constant 0 : index
    %175 = vector.load %arg3[%c19, %c0_91] : memref<20x128xf32, #tpu.memory_space<vmem>>, vector<1x128xf32>
    %176 = vector.broadcast %175 : vector<1x128xf32> to vector<32x128xf32>
    %177 = arith.addf %174, %176 : vector<32x128xf32>
    %c0_92 = arith.constant 0 : index
    %c0_93 = arith.constant 0 : index
    %178 = vector.load %arg4[%c0_92, %c0_93] : memref<32x128xf32, #tpu.memory_space<vmem>>, vector<32x128xf32>
    tpu.vector_store %arg4[%c0_92, %c0_93], %177 {strides = array<i32>} : memref<32x128xf32, #tpu.memory_space<vmem>>, vector<32x128xf32>,
    return
  }
  func.func @transform_0(%arg0: i32) -> (i32, i32) {
    %c0_i32 = arith.constant 0 : i32
    %c0_i32_0 = arith.constant 0 : i32
    return %arg0, %c0_i32 : i32, i32
  }
  func.func @transform_1(%arg0: i32) -> (i32, i32, i32) {
    %c0_i32 = arith.constant 0 : i32
    %c0_i32_0 = arith.constant 0 : i32
    %c0_i32_1 = arith.constant 0 : i32
    %c0_i32_2 = arith.constant 0 : i32
    return %c0_i32, %c0_i32_0, %c0_i32_1 : i32, i32, i32
  }
  func.func @transform_2(%arg0: i32) -> (i32, i32) {
    %c0_i32 = arith.constant 0 : i32
    %c0_i32_0 = arith.constant 0 : i32
    %c0_i32_1 = arith.constant 0 : i32
    return %c0_i32, %c0_i32_0 : i32, i32
  }
  func.func @transform_3(%arg0: i32) -> (i32, i32) {
    %c0_i32 = arith.constant 0 : i32
    %c0_i32_0 = arith.constant 0 : i32
    return %arg0, %c0_i32 : i32, i32
  }
}

</mosaic_0001>

<bundles_post_ra>
// kernel: mwt1d_forward.1
= control target key start
LH: loop header
LB: loop body
LE: loop exit
PB: predicated region body
PF: predicated region fallthrough
CT: control target
= control target key end

     0   :  { %8 = vsyncpa [#allocation3], 0  ;;  %s2618_s12 = smov [#allocation2]   ;;  %s2878_s0 = inlined_call_operand.vmem [shape: f32[32,128], index: 0, kind: input, shape index: {}]   ;;  %s2879_s1 = inlined_call_operand.hbm [shape: f32[11,128,128], index: 1, kind: input, shape index: {}]   ;;  %s2880_s2 = inlined_call_operand.vmem [shape: f32[20,128], index: 2, kind: input, shape index: {}]   ;;  %s2881_s3 = inlined_call_operand.vmem [shape: f32[32,128], index: 3, kind: output, shape index: {}]  }
   0x1   :  { %s16_s13 = sshll.u32 %s2618_s12, 4  ;;  %s2594_s16 = scalar_lea.hbm %s2879_s1, 22528  ;;  %s17_s13 = int_to_ptr.vmem [resolvable:$true] %s16_s13 }
   0x2   :  { %p2595_p0 = scmp.ne.s32.totalorder %s2879_s1, %s2594_s16  ;;  %p2598_p1 = scmp.lt.u32.totalorder %s2594_s16, %s2879_s1 }
   0x4   :  { %p2600_p2 = pnand %p2598_p1, %p2595_p0 }
   0x6   :  { %2603 = shalt.err (!%p2600_p2)
}
   0x7   :  { %s2604_s21 = scalar_lea.vmem %s17_s13, 22528  ;;  %p2609_p4 = scmp.lt.s32.totalorder %s17_s13, %s17_s13 }
   0x8   :  { %p2605_p3 = scmp.ne.s32.totalorder %s17_s13, %s2604_s21  ;;  %p2610_p5 = scmp.lt.s32.totalorder %s2604_s21, %s2604_s21 }
   0xa   :  { %p2611_p6 = por %p2610_p5, %p2609_p4 }
   0xc   :  { %p2612_p7 = pnand %p2611_p6, %p2605_p3 }
   0xe   :  { %2615 = shalt.err (!%p2612_p7)
}
   0xf   :  { %s2619_s22 = smov 128   ;;  %s2620_s23 = smov 8  }
  0x10   :  { %22 = dma.hbm_to_vmem [thread:$0]  %s2879_s1, 22528, %s17_s13, [#allocation3], %s2619_s22, %s2619_s22, %s2620_s23  }
  0x11   :  { %2616 = dma.done.wait [#allocation3], 22528  }
  0x12   :  { %2617 = vsyncadd [#allocation3], 4294944768  ;;  %v32_v0 = vld [vmem:[#allocation2] sm:$0xff]  ;;  %v33_v1 = vld [vmem:[#allocation2 + $0x8] sm:$0xff] }
  0x13   :  { %v34_v2 = vld [vmem:[#allocation2 + $0x10] sm:$0xff]  ;;  %v2175_v3 = vpack.c.bf16 %v33_v1, %v32_v0  ;;  %v35_v4 = vld [vmem:[#allocation2 + $0x18] sm:$0xff]  ;;  %v36_v6 = vld [vmem:[#allocation2 + $0x20] sm:$0xff] }
  0x14   :  { %v2179_v5 = vpack.c.bf16 %v35_v4, %v34_v2  ;;  %v37_v7 = vld [vmem:[#allocation2 + $0x28] sm:$0xff]  ;;  %v28_v9 = vld [vmem:[%s2878_s0] sm:$0xff]  ;;  %v38_v10 = vld [vmem:[#allocation2 + $0x30] sm:$0xff] }
  0x15   :  { %2176 = vmatprep.subr.bf16.mxu0 %v2175_v3  ;;  %v2183_v8 = vpack.c.bf16 %v37_v7, %v36_v6  ;;  %v39_v11 = vld [vmem:[#allocation2 + $0x38] sm:$0xff]  ;;  %1789 = vmatprep.mubr.f32.mxu0 %v28_v9  ;;  %v142_v12 = vld [vmem:[#allocation2 + $0x80] sm:$0xff]  ;;  %v143_v13 = vld [vmem:[#allocation2 + $0x88] sm:$0xff] }
  0x16   :  { %2178 = vmatpush3.bf16.msra.mxu0 %v2175_v3  ;;  %v144_v14 = vld [vmem:[#allocation2 + $0x90] sm:$0xff]  ;;  %v145_v15 = vld [vmem:[#allocation2 + $0x98] sm:$0xff]  ;;  %v2207_v16 = vpack.c.bf16 %v143_v13, %v142_v12  ;;  %v2187_v18 = vpack.c.bf16 %v39_v11, %v38_v10  ;;  %v146_v19 = vld [vmem:[#allocation2 + $0xa0] sm:$0xff]  ;;  %v138_v12 = vlaneseq }
  0x17   :  { %2180 = vmatprep.subr.bf16.mxu0 %v2179_v5  ;;  %v2211_v17 = vpack.c.bf16 %v145_v15, %v144_v14  ;;  %v147_v20 = vld [vmem:[#allocation2 + $0xa8] sm:$0xff]  ;;  %v40_v21 = vld [vmem:[#allocation2 + $0x40] sm:$0xff]  ;;  %v148_v25 = vld [vmem:[#allocation2 + $0xb0] sm:$0xff] }
  0x18   :  { %v41_v22 = vld [vmem:[#allocation2 + $0x48] sm:$0xff]  ;;  %2208 = vmatprep.subr.bf16.mxu1 %v2207_v16  ;;  %v2215_v23 = vpack.c.bf16 %v147_v20, %v146_v19  ;;  %v149_v26 = vld [vmem:[#allocation2 + $0xb8] sm:$0xff]  ;;  %v42_v27 = vld [vmem:[#allocation2 + $0x50] sm:$0xff]  ;;  %v2683_v13 = vand.u32 127, %v138_v12 }
  0x19   :  { %2210 = vmatpush3.bf16.msra.mxu1 %v2207_v16  ;;  %v2191_v24 = vpack.c.bf16 %v41_v22, %v40_v21  ;;  %v43_v28 = vld [vmem:[#allocation2 + $0x58] sm:$0xff]  ;;  %v2219_v29 = vpack.c.bf16 %v149_v26, %v148_v25  ;;  %v150_v31 = vld [vmem:[#allocation2 + $0xc0] sm:$0xff]  ;;  %v151_v32 = vld [vmem:[#allocation2 + $0xc8] sm:$0xff] }
  0x1a   :  { %2182 = vmatpush3.bf16.msra.mxu0 %v2179_v5  ;;  %2212 = vmatprep.subr.bf16.mxu1 %v2211_v17  ;;  %v2195_v30 = vpack.c.bf16 %v43_v28, %v42_v27  ;;  %v44_v33 = vld [vmem:[#allocation2 + $0x60] sm:$0xff]  ;;  %v45_v34 = vld [vmem:[#allocation2 + $0x68] sm:$0xff]  ;;  %v2223_v35 = vpack.c.bf16 %v151_v32, %v150_v31  ;;  %v152_v37 = vld [vmem:[#allocation2 + $0xd0] sm:$0xff]  ;;  %vm140_vm0 = vcmp.lt.s32.totalorder %v2683_v13, 24 }
  0x1b   :  { %2184 = vmatprep.subr.bf16.mxu0 %v2183_v8  ;;  %v2199_v36 = vpack.c.bf16 %v45_v34, %v44_v33  ;;  %v153_v38 = vld [vmem:[#allocation2 + $0xd8] sm:$0xff]  ;;  %v46_v39 = vld [vmem:[#allocation2 + $0x70] sm:$0xff]  ;;  %v154_v43 = vld [vmem:[#allocation2 + $0xe0] sm:$0xff] }
  0x1c   :  { %v47_v40 = vld [vmem:[#allocation2 + $0x78] sm:$0xff]  ;;  %v2227_v41 = vpack.c.bf16 %v153_v38, %v152_v37  ;;  %v155_v44 = vld [vmem:[#allocation2 + $0xe8] sm:$0xff]  ;;  %v30_v47 = vld [vmem:[%s2878_s0 + $0x10] sm:$0xff] }
  0x1d   :  { %2214 = vmatpush3.bf16.msra.mxu1 %v2211_v17  ;;  %v2203_v42 = vpack.c.bf16 %v47_v40, %v46_v39  ;;  %v2231_v45 = vpack.c.bf16 %v155_v44, %v154_v43  ;;  %v29_v46 = vld [vmem:[%s2878_s0 + $0x8] sm:$0xff]  ;;  %v31_v48 = vld [vmem:[%s2878_s0 + $0x18] sm:$0xff]  ;;  %v156_v49 = vld [vmem:[#allocation2 + $0xf0] sm:$0xff] }
  0x1e   :  { %2186 = vmatpush3.bf16.msra.mxu0 %v2183_v8  ;;  %2216 = vmatprep.subr.bf16.mxu1 %v2215_v23  ;;  %v157_v50 = vld [vmem:[#allocation2 + $0xf8] sm:$0xff]  ;;  %v1517_v52 = vld [vmem:[%s2880_s2] ss:$0 sm:$0xff]  ;;  %v1518_v61 = vld [vmem:[%s2880_s2 + $0x1] ss:$0 sm:$0xff] }
  0x1f   :  { %2188 = vmatprep.subr.bf16.mxu0 %v2187_v18  ;;  %v2235_v51 = vpack.c.bf16 %v157_v50, %v156_v49  ;;  %v315_v6 = vld [vmem:[#allocation2 + $0x100] sm:$0xff]  ;;  %v316_v7 = vld [vmem:[#allocation2 + $0x108] sm:$0xff]  ;;  %v317_v8 = vld [vmem:[#allocation2 + $0x110] sm:$0xff] }
  0x20   :  { %v2239_v9 = vpack.c.bf16 %v316_v7, %v315_v6  ;;  %v318_v10 = vld [vmem:[#allocation2 + $0x118] sm:$0xff]  ;;  %v319_v34 = vld [vmem:[#allocation2 + $0x120] sm:$0xff]  ;;  %v321_v37 = vld [vmem:[#allocation2 + $0x130] sm:$0xff] }
  0x21   :  { %2218 = vmatpush3.bf16.msra.mxu1 %v2215_v23  ;;  %v2243_v11 = vpack.c.bf16 %v318_v10, %v317_v8  ;;  %v322_v38 = vld [vmem:[#allocation2 + $0x138] sm:$0xff]  ;;  %v323_v40 = vld [vmem:[#allocation2 + $0x140] sm:$0xff]  ;;  %v325_v43 = vld [vmem:[#allocation2 + $0x150] sm:$0xff] }
  0x22   :  { %2190 = vmatpush3.bf16.msra.mxu0 %v2187_v18  ;;  %2220 = vmatprep.subr.bf16.mxu1 %v2219_v29  ;;  %v2251_v39 = vpack.c.bf16 %v322_v38, %v321_v37  ;;  %v326_v44 = vld [vmem:[#allocation2 + $0x158] sm:$0xff]  ;;  %v329_v49 = vld [vmem:[#allocation2 + $0x170] sm:$0xff] }
  0x23   :  { %2192 = vmatprep.subr.bf16.mxu0 %v2191_v24  ;;  %v330_v50 = vld [vmem:[#allocation2 + $0x178] sm:$0xff] }
  0x25   :  { %2222 = vmatpush3.bf16.msra.mxu1 %v2219_v29 }
  0x26   :  { %2194 = vmatpush3.bf16.msra.mxu0 %v2191_v24  ;;  %2224 = vmatprep.subr.bf16.mxu1 %v2223_v35 }
  0x27   :  { %2196 = vmatprep.subr.bf16.mxu0 %v2195_v30 }
  0x29   :  { %2226 = vmatpush3.bf16.msra.mxu1 %v2223_v35  ;;  %v320_v35 = vld [vmem:[#allocation2 + $0x128] sm:$0xff] }
  0x2a   :  { %2198 = vmatpush3.bf16.msra.mxu0 %v2195_v30  ;;  %2228 = vmatprep.subr.bf16.mxu1 %v2227_v41 }
  0x2b   :  { %2200 = vmatprep.subr.bf16.mxu0 %v2199_v36 }
  0x2d   :  { %2230 = vmatpush3.bf16.msra.mxu1 %v2227_v41  ;;  %v324_v41 = vld [vmem:[#allocation2 + $0x148] sm:$0xff] }
  0x2e   :  { %2202 = vmatpush3.bf16.msra.mxu0 %v2199_v36  ;;  %2232 = vmatprep.subr.bf16.mxu1 %v2231_v45  ;;  %v2247_v36 = vpack.c.bf16 %v320_v35, %v319_v34  ;;  %v448_v35 = vld [vmem:[#allocation2 + $0x1b0] sm:$0xff] }
  0x2f   :  { %2204 = vmatprep.subr.bf16.mxu0 %v2203_v42 }
  0x31   :  { %2234 = vmatpush3.bf16.msra.mxu1 %v2231_v45  ;;  %v2259_v45 = vpack.c.bf16 %v326_v44, %v325_v43  ;;  %v456_v44 = vld [vmem:[#allocation2 + $0x1f0] sm:$0xff] }
  0x32   :  { %2206 = vmatpush3.bf16.msra.mxu0 %v2203_v42  ;;  %2236 = vmatprep.subr.bf16.mxu1 %v2235_v51  ;;  %v2255_v42 = vpack.c.bf16 %v324_v41, %v323_v40  ;;  %v453_v40 = vld [vmem:[#allocation2 + $0x1d8] sm:$0xff] }
  0x33   :  { %2240 = vmatprep.subr.bf16.mxu0 %v2239_v9 }
  0x35   :  { %1790 = vmatmul.mubr.f32.vlgmr.msra.gmra.mrb[0].mxu0 %v29_v46  ;;  %2238 = vmatpush3.bf16.msra.mxu1 %v2235_v51  ;;  %v327_v46 = vld [vmem:[#allocation2 + $0x160] sm:$0xff]  ;;  %v2267_v51 = vpack.c.bf16 %v330_v50, %v329_v49  ;;  %v564_v49 = vld [vmem:[#allocation2 + $0x210] sm:$0xff] }
  0x36   :  { %1792 = vmatprep.mubr.f32.mxu0 %v30_v47  ;;  %2242 = vmatpush3.bf16.msra.mxu0 %v2239_v9  ;;  %v328_v47 = vld [vmem:[#allocation2 + $0x168] sm:$0xff] }
  0x37   :  { %2244 = vmatprep.subr.bf16.mxu0 %v2243_v11 }
  0x39   :  { %1793 = vmatmul.mubr.f32.gmra.mrb[2].mxu0 %v31_v48  ;;  %v2263_v48 = vpack.c.bf16 %v328_v47, %v327_v46  ;;  %v562_v47 = vld [vmem:[#allocation2 + $0x200] sm:$0xff] }
  0x3a   :  { %2246 = vmatpush3.bf16.msra.mxu0 %v2243_v11 }
  0x3b   :  { %2248 = vmatprep.subr.bf16.mxu0 %v2247_v36 }
  0x3e   :  { %2250 = vmatpush3.bf16.msra.mxu0 %v2247_v36  ;;  %v449_v36 = vld [vmem:[#allocation2 + $0x1b8] sm:$0xff] }
  0x3f   :  { %2252 = vmatprep.subr.bf16.mxu0 %v2251_v39  ;;  %v2283_v37 = vpack.c.bf16 %v449_v36, %v448_v35 }
  0x42   :  { %2254 = vmatpush3.bf16.msra.mxu0 %v2251_v39  ;;  %v452_v39 = vld [vmem:[#allocation2 + $0x1d0] sm:$0xff] }
  0x43   :  { %2256 = vmatprep.subr.bf16.mxu0 %v2255_v42  ;;  %v2291_v41 = vpack.c.bf16 %v453_v40, %v452_v39  ;;  %v576_v39 = vld [vmem:[#allocation2 + $0x270] sm:$0xff]  ;;  %v577_v40 = vld [vmem:[#allocation2 + $0x278] sm:$0xff] }
  0x46   :  { %2258 = vmatpush3.bf16.msra.mxu0 %v2255_v42  ;;  %v455_v42 = vld [vmem:[#allocation2 + $0x1e8] sm:$0xff] }
  0x47   :  { %2260 = vmatprep.subr.bf16.mxu0 %v2259_v45 }
  0x4a   :  { %2262 = vmatpush3.bf16.msra.mxu0 %v2259_v45  ;;  %v457_v45 = vld [vmem:[#allocation2 + $0x1f8] sm:$0xff] }
  0x4b   :  { %2264 = vmatprep.subr.bf16.mxu0 %v2263_v48  ;;  %v2299_v46 = vpack.c.bf16 %v457_v45, %v456_v44 }
  0x4e   :  { %2266 = vmatpush3.bf16.msra.mxu0 %v2263_v48  ;;  %v563_v48 = vld [vmem:[#allocation2 + $0x208] sm:$0xff] }
  0x4f   :  { %2268 = vmatprep.subr.bf16.mxu0 %v2267_v51  ;;  %v2303_v50 = vpack.c.bf16 %v563_v48, %v562_v47 }
  0x52   :  { %2270 = vmatpush3.bf16.msra.mxu0 %v2267_v51  ;;  %v565_v51 = vld [vmem:[#allocation2 + $0x218] sm:$0xff] }
  0x53   :  { %2304 = vmatprep.subr.bf16.mxu0 %v2303_v50 }
 0x108   :  { %v1791_v53 = vpop.f32.mrb[0].mxu0 }
 0x109   :  { %v119_v54 = vpop.f32.mrb[1].mxu0  ;;  %v2670_v56 = vadd.f32 %v1791_v53, %v1517_v52  ;;  %v443_v53 = vld [vmem:[#allocation2 + $0x188] sm:$0xff] }
 0x10a   :  { %v2668_v55 = vadd.f32 %v1517_v52, %v119_v54  ;;  %v444_v54 = vld [vmem:[#allocation2 + $0x190] sm:$0xff] }
 0x10c   :  { %v1794_v57 = vpop.f32.mrb[2].mxu0  ;;  %1827 = vmatprep.mubr.f32.mxu1 %v2668_v55 }
 0x10d   :  { %v129_v58 = vpop.f32.mrb[3].mxu0  ;;  %1828 = vmatmul.mubr.f32.vlgmr.msra.gmra.mrb[0].mxu1 %v2670_v56  ;;  %v2676_v60 = vadd.f32 %v1794_v57, %v1517_v52 }
 0x10e   :  { %v2674_v59 = vadd.f32 %v1517_v52, %v129_v58  ;;  %v442_v52 = vld [vmem:[#allocation2 + $0x180] sm:$0xff]  ;;  %v445_v58 = vld [vmem:[#allocation2 + $0x198] sm:$0xff] }
 0x10f   :  { %v2271_v57 = vpack.c.bf16 %v443_v53, %v442_v52  ;;  %v2307_v52 = vpack.c.bf16 %v565_v51, %v564_v49  ;;  %v566_v53 = vld [vmem:[#allocation2 + $0x220] sm:$0xff] }
 0x110   :  { %1830 = vmatprep.mubr.f32.mxu1 %v2674_v59 }
 0x111   :  { %1831 = vmatmul.mubr.f32.gmra.mrb[2].mxu1 %v2676_v60  ;;  %2272 = vmatprep.subr.bf16.mxu1 %v2271_v57 }
 0x112   :  { %2274 = vmatpush3.bf16.msra.mxu1 %v2271_v57 }
 0x1e0   :  { %v1829_v62 = vpop.f32.mrb[0].mxu1 }
 0x1e1   :  { %v229_v63 = vpop.f32.mrb[1].mxu1  ;;  %v235_v3 = vadd.f32 %v1829_v62, %v1518_v61  ;;  %v446_v62 = vld [vmem:[#allocation2 + $0x1a0] sm:$0xff] }
 0x1e2   :  { %v230_v0 = vadd.f32 %v1518_v61, %v229_v63  ;;  %v447_v63 = vld [vmem:[#allocation2 + $0x1a8] sm:$0xff] }
 0x1e4   :  { %v1832_v1 = vpop.f32.mrb[2].mxu1  ;;  %248 = vadd.xlane.f32.xlu0 %v230_v0 }
 0x1e5   :  { %v239_v2 = vpop.f32.mrb[3].mxu1  ;;  %v245_v5 = vadd.f32 %v1832_v1, %v1518_v61 }
 0x1e6   :  { %v240_v4 = vadd.f32 %v1518_v61, %v239_v2  ;;  %v2275_v61 = vpack.c.bf16 %v445_v58, %v444_v54  ;;  %v567_v54 = vld [vmem:[#allocation2 + $0x228] sm:$0xff]  ;;  %v568_v58 = vld [vmem:[#allocation2 + $0x230] sm:$0xff] }
 0x1e7   :  { %v2311_v57 = vpack.c.bf16 %v567_v54, %v566_v53 }
 0x1e8   :  { %252 = vadd.xlane.f32.xlu1 %v240_v4  ;;  %250 = vadd.xlane.f32.xlu0 %v235_v3 }
 0x1e9   :  { %2276 = vmatprep.subr.bf16.mxu1 %v2275_v61 }
 0x1ea   :  { %2278 = vmatpush3.bf16.msra.mxu1 %v2275_v61  ;;  %v569_v61 = vld [vmem:[#allocation2 + $0x238] sm:$0xff] }
 0x1ec   :  { %254 = vadd.xlane.f32.xlu1 %v245_v5 }
 0x271   :  { %v249_v14 = vpop.xlane.xlu0 %248 }
 0x272   :  { %v256_v15 = vmul.f32 0.041666668, %v249_v14 }
 0x274   :  { %v260_v16 = vsub.f32 %v230_v0, %v256_v15  ;;  %v2279_v0 = vpack.c.bf16 %v447_v63, %v446_v62  ;;  %v1519_v15 = vld [vmem:[%s2880_s2 + $0x2] ss:$0 sm:$0xff]  ;;  %v2315_v62 = vpack.c.bf16 %v569_v61, %v568_v58 }
 0x275   :  { %v253_v17 = vpop.xlane.xlu1 %252  ;;  %v251_v18 = vpop.xlane.xlu0 %250  ;;  %v570_v63 = vld [vmem:[#allocation2 + $0x240] sm:$0xff] }
 0x276   :  { %v258_v19 = vmul.f32 0.041666668, %v253_v17  ;;  %v257_v20 = vmul.f32 0.041666668, %v251_v18  ;;  %v2688_v21 = vsel %vm140_vm0, %v260_v16, 0.0  ;;  %2280 = vmatprep.subr.bf16.mxu1 %v2279_v0 }
 0x277   :  { %v268_v22 = vmul.f32 %v2688_v21, %v2688_v21  ;;  %2282 = vmatpush3.bf16.msra.mxu1 %v2279_v0  ;;  %v1520_v17 = vld [vmem:[%s2880_s2 + $0x3] ss:$0 sm:$0xff]  ;;  %v571_v0 = vld [vmem:[#allocation2 + $0x248] sm:$0xff] }
 0x278   :  { %v262_v23 = vsub.f32 %v240_v4, %v258_v19  ;;  %v261_v24 = vsub.f32 %v235_v3, %v257_v20  ;;  %2284 = vmatprep.subr.bf16.mxu1 %v2283_v37 }
 0x279   :  { %v255_v25 = vpop.xlane.xlu1 %254  ;;  %272 = vadd.xlane.f32.xlu0 %v268_v22 }
 0x27a   :  { %v259_v26 = vmul.f32 0.041666668, %v255_v25  ;;  %v2694_v27 = vsel %vm140_vm0, %v262_v23, 0.0  ;;  %v2698_v28 = vsel %vm140_vm0, %v261_v24, 0.0 }
 0x27b   :  { %v270_v29 = vmul.f32 %v2694_v27, %v2694_v27  ;;  %v269_v30 = vmul.f32 %v2698_v28, %v2698_v28  ;;  %2286 = vmatpush3.bf16.msra.mxu1 %v2283_v37 }
 0x27c   :  { %v263_v31 = vsub.f32 %v245_v5, %v259_v26 }
 0x27d   :  { %276 = vadd.xlane.f32.xlu0 %v270_v29  ;;  %274 = vadd.xlane.f32.xlu1 %v269_v30 }
 0x27e   :  { %v2706_v32 = vsel %vm140_vm0, %v263_v31, 0.0 }
 0x27f   :  { %v271_v33 = vmul.f32 %v2706_v32, %v2706_v32 }
 0x281   :  { %278 = vadd.xlane.f32.xlu1 %v271_v33 }
 0x306   :  { %v273_v1 = vpop.xlane.xlu0 %272 }
 0x307   :  { %v280_v2 = vmul.f32 0.041666668, %v273_v1  ;;  %v2319_v1 = vpack.c.bf16 %v571_v0, %v570_v63 }
 0x309   :  { %v284_v3 = vadd.f32 1e-05, %v280_v2  ;;  %v572_v2 = vld [vmem:[#allocation2 + $0x250] sm:$0xff] }
 0x30a   :  { %v275_v4 = vpop.xlane.xlu1 %274  ;;  %v277_v5 = vpop.xlane.xlu0 %276 }
 0x30b   :  { %2546 = vrsqrt.f32 %v284_v3  ;;  %v281_v6 = vmul.f32 0.041666668, %v275_v4  ;;  %v282_v7 = vmul.f32 0.041666668, %v277_v5  ;;  %v573_v3 = vld [vmem:[#allocation2 + $0x258] sm:$0xff] }
 0x30c   :  { %v2323_v4 = vpack.c.bf16 %v573_v3, %v572_v2  ;;  %v1521_v5 = vld [vmem:[%s2880_s2 + $0x4] ss:$0 sm:$0xff] }
 0x30d   :  { %v285_v8 = vadd.f32 1e-05, %v281_v6  ;;  %v286_v9 = vadd.f32 1e-05, %v282_v7 }
 0x30e   :  { %v279_v10 = vpop.xlane.xlu1 %278 }
 0x30f   :  { %2548 = vrsqrt.f32 %v285_v8  ;;  %v283_v11 = vmul.f32 0.041666668, %v279_v10 }
 0x310   :  { %2550 = vrsqrt.f32 %v286_v9 }
 0x311   :  { %v287_v12 = vadd.f32 1e-05, %v283_v11 }
 0x313   :  { %2552 = vrsqrt.f32 %v287_v12 }
 0x315   :  { %v2547_v14 = vpop.eup %2546 }
 0x316   :  { %v292_v16 = vmul.f32 %v2547_v14, %v2688_v21 }
 0x318   :  { %v301_v18 = vmul.f32 %v1519_v15, %v292_v16 }
 0x319   :  { %v2549_v19 = vpop.eup %2548 }
 0x31a   :  { %v2551_v20 = vpop.eup %2550  ;;  %v293_v22 = vmul.f32 %v2549_v19, %v2698_v28  ;;  %v310_v23 = vadd.f32 %v1520_v17, %v301_v18  ;;  %v450_v28 = vld [vmem:[#allocation2 + $0x1c0] sm:$0xff] }
 0x31b   :  { %v294_v24 = vmul.f32 %v2551_v20, %v2694_v27  ;;  %v451_v27 = vld [vmem:[#allocation2 + $0x1c8] sm:$0xff] }
 0x31c   :  { %1865 = vmatprep.mubr.f32.mxu0 %v310_v23  ;;  %v302_v25 = vmul.f32 %v1519_v15, %v293_v22  ;;  %v2287_v38 = vpack.c.bf16 %v451_v27, %v450_v28  ;;  %v574_v28 = vld [vmem:[#allocation2 + $0x260] sm:$0xff]  ;;  %v575_v27 = vld [vmem:[#allocation2 + $0x268] sm:$0xff] }
 0x31d   :  { %v2553_v26 = vpop.eup %2552  ;;  %v303_v29 = vmul.f32 %v1519_v15, %v294_v24 }
 0x31e   :  { %v311_v30 = vadd.f32 %v1520_v17, %v302_v25  ;;  %v295_v31 = vmul.f32 %v2553_v26, %v2706_v32  ;;  %2288 = vmatprep.subr.bf16.mxu1 %v2287_v38  ;;  %v454_v32 = vld [vmem:[#allocation2 + $0x1e0] sm:$0xff] }
 0x31f   :  { %v312_v21 = vadd.f32 %v1520_v17, %v303_v29  ;;  %2290 = vmatpush3.bf16.msra.mxu1 %v2287_v38  ;;  %v2295_v43 = vpack.c.bf16 %v455_v42, %v454_v32  ;;  %v2327_v38 = vpack.c.bf16 %v575_v27, %v574_v28  ;;  %v1522_v32 = vld [vmem:[%s2880_s2 + $0x5] ss:$0 sm:$0xff]  ;;  %v742_v28 = vld [vmem:[#allocation2 + $0x2b8] sm:$0xff] }
 0x320   :  { %1866 = vmatmul.mubr.f32.vlgmr.msra.gmra.mrb[4].mxu0 %v311_v30  ;;  %v304_v33 = vmul.f32 %v1519_v15, %v295_v31  ;;  %2292 = vmatprep.subr.bf16.mxu1 %v2291_v41 }
 0x321   :  { %1868 = vmatprep.mubr.f32.mxu0 %v312_v21  ;;  %2306 = vmatpush3.bf16.msra.mxu0 %v2303_v50 }
 0x322   :  { %v313_v34 = vadd.f32 %v1520_v17, %v304_v33  ;;  %2308 = vmatprep.subr.bf16.mxu0 %v2307_v52 }
 0x323   :  { %2294 = vmatpush3.bf16.msra.mxu1 %v2291_v41  ;;  %v2331_v41 = vpack.c.bf16 %v577_v40, %v576_v39  ;;  %v744_v39 = vld [vmem:[#allocation2 + $0x2c8] sm:$0xff] }
 0x324   :  { %1869 = vmatmul.mubr.f32.gmra.mrb[6].mxu0 %v313_v34  ;;  %2296 = vmatprep.subr.bf16.mxu1 %v2295_v43 }
 0x325   :  { %2310 = vmatpush3.bf16.msra.mxu0 %v2307_v52 }
 0x326   :  { %2312 = vmatprep.subr.bf16.mxu0 %v2311_v57 }
 0x327   :  { %2298 = vmatpush3.bf16.msra.mxu1 %v2295_v43  ;;  %v1523_v43 = vld [vmem:[%s2880_s2 + $0x6] ss:$0 sm:$0xff] }
 0x328   :  { %2300 = vmatprep.subr.bf16.mxu1 %v2299_v46 }
 0x329   :  { %2314 = vmatpush3.bf16.msra.mxu0 %v2311_v57 }
 0x32a   :  { %2316 = vmatprep.subr.bf16.mxu0 %v2315_v62 }
 0x32b   :  { %2302 = vmatpush3.bf16.msra.mxu1 %v2299_v46 }
 0x32d   :  { %2318 = vmatpush3.bf16.msra.mxu0 %v2315_v62 }
 0x32e   :  { %2320 = vmatprep.subr.bf16.mxu0 %v2319_v1 }
 0x331   :  { %2322 = vmatpush3.bf16.msra.mxu0 %v2319_v1 }
 0x332   :  { %2324 = vmatprep.subr.bf16.mxu0 %v2323_v4 }
 0x335   :  { %2326 = vmatpush3.bf16.msra.mxu0 %v2323_v4 }
 0x336   :  { %2328 = vmatprep.subr.bf16.mxu0 %v2327_v38 }
 0x339   :  { %2330 = vmatpush3.bf16.msra.mxu0 %v2327_v38  ;;  %v743_v38 = vld [vmem:[#allocation2 + $0x2c0] sm:$0xff] }
 0x33a   :  { %2332 = vmatprep.subr.bf16.mxu0 %v2331_v41  ;;  %v2351_v40 = vpack.c.bf16 %v744_v39, %v743_v38  ;;  %v874_v39 = vld [vmem:[#allocation2 + $0x360] sm:$0xff] }
 0x33d   :  { %2334 = vmatpush3.bf16.msra.mxu0 %v2331_v41  ;;  %v745_v41 = vld [vmem:[#allocation2 + $0x2d0] sm:$0xff] }
 0x3f3   :  { %v1867_v6 = vpop.f32.mrb[4].mxu0 }
 0x3f4   :  { %v408_v7 = vadd.f32 %v1867_v6, %v1521_v5  ;;  %v402_v8 = vpop.f32.mrb[5].mxu0  ;;  %v737_v6 = vld [vmem:[#allocation2 + $0x290] sm:$0xff] }
 0x3f5   :  { %v403_v9 = vadd.f32 %v1521_v5, %v402_v8  ;;  %v738_v8 = vld [vmem:[#allocation2 + $0x298] sm:$0xff] }
 0x3f6   :  { %v426_v10 = vmul.f32 0.70710677, %v408_v7  ;;  %v422_v25 = vmul.f32 0.5, %v408_v7 }
 0x3f7   :  { %v425_v11 = vmul.f32 0.70710677, %v403_v9  ;;  %v1870_v12 = vpop.f32.mrb[6].mxu0  ;;  %v421_v23 = vmul.f32 0.5, %v403_v9  ;;  %v2339_v9 = vpack.c.bf16 %v738_v8, %v737_v6 }
 0x3f8   :  { %2554 = verf.f32 %v426_v10  ;;  %v418_v14 = vadd.f32 %v1870_v12, %v1521_v5  ;;  %v412_v15 = vpop.f32.mrb[7].mxu0  ;;  %v739_v10 = vld [vmem:[#allocation2 + $0x2a0] sm:$0xff] }
 0x3f9   :  { %2556 = verf.f32 %v425_v11  ;;  %v413_v16 = vadd.f32 %v1521_v5, %v412_v15  ;;  %v736_v5 = vld [vmem:[#allocation2 + $0x288] sm:$0xff] }
 0x3fa   :  { %v428_v17 = vmul.f32 0.70710677, %v418_v14  ;;  %v424_v35 = vmul.f32 0.5, %v418_v14  ;;  %v740_v11 = vld [vmem:[#allocation2 + $0x2a8] sm:$0xff] }
 0x3fb   :  { %v427_v18 = vmul.f32 0.70710677, %v413_v16  ;;  %v423_v33 = vmul.f32 0.5, %v413_v16  ;;  %v2343_v12 = vpack.c.bf16 %v740_v11, %v739_v10  ;;  %v1525_v11 = vld [vmem:[%s2880_s2 + $0x8] ss:$0 sm:$0xff] }
 0x3fc   :  { %2558 = verf.f32 %v428_v17 }
 0x3fd   :  { %2560 = verf.f32 %v427_v18 }
 0x402   :  { %v2555_v19 = vpop.eup %2554 }
 0x403   :  { %v2557_v20 = vpop.eup %2556  ;;  %v434_v22 = vadd.f32 1.0, %v2555_v19 }
 0x404   :  { %v433_v24 = vadd.f32 1.0, %v2557_v20 }
 0x405   :  { %v438_v31 = vmul.f32 %v434_v22, %v422_v25 }
 0x406   :  { %v2559_v26 = vpop.eup %2558  ;;  %v437_v29 = vmul.f32 %v433_v24, %v421_v23 }
 0x407   :  { %v2561_v30 = vpop.eup %2560  ;;  %v436_v21 = vadd.f32 1.0, %v2559_v26 }
 0x408   :  { %v435_v34 = vadd.f32 1.0, %v2561_v30  ;;  %1903 = vmatprep.mubr.f32.mxu1 %v437_v29 }
 0x409   :  { %1904 = vmatmul.mubr.f32.vlgmr.msra.gmra.mrb[4].mxu1 %v438_v31  ;;  %v440_v37 = vmul.f32 %v436_v21, %v424_v35 }
 0x40a   :  { %v439_v36 = vmul.f32 %v435_v34, %v423_v33 }
 0x40c   :  { %1906 = vmatprep.mubr.f32.mxu1 %v439_v36 }
 0x40d   :  { %1907 = vmatmul.mubr.f32.gmra.mrb[6].mxu1 %v440_v37  ;;  %v741_v37 = vld [vmem:[#allocation2 + $0x2b0] sm:$0xff] }
 0x40e   :  { %v2347_v27 = vpack.c.bf16 %v742_v28, %v741_v37  ;;  %v870_v37 = vld [vmem:[#allocation2 + $0x340] sm:$0xff]  ;;  %v871_v28 = vld [vmem:[#allocation2 + $0x348] sm:$0xff] }
 0x4dc   :  { %v1905_v42 = vpop.f32.mrb[4].mxu1 }
 0x4dd   :  { %v535_v44 = vadd.f32 %v1905_v42, %v1522_v32  ;;  %v529_v45 = vpop.f32.mrb[5].mxu1 }
 0x4de   :  { %v530_v46 = vadd.f32 %v1522_v32, %v529_v45 }
 0x4df   :  { %v554_v47 = vmul.f32 %v1523_v43, %v535_v44  ;;  %v748_v44 = vld [vmem:[#allocation2 + $0x2e8] sm:$0xff] }
 0x4e0   :  { %v553_v48 = vmul.f32 %v1523_v43, %v530_v46  ;;  %v1908_v49 = vpop.f32.mrb[6].mxu1  ;;  %v749_v46 = vld [vmem:[#allocation2 + $0x2f0] sm:$0xff] }
 0x4e1   :  { %v545_v50 = vadd.f32 %v1908_v49, %v1522_v32  ;;  %v539_v51 = vpop.f32.mrb[7].mxu1  ;;  %v2733_v54 = vadd.f32 %v554_v47, %v2670_v56  ;;  %v750_v47 = vld [vmem:[#allocation2 + $0x2f8] sm:$0xff]  ;;  %v862_v49 = vld [vmem:[#allocation2 + $0x300] sm:$0xff] }
 0x4e2   :  { %v540_v52 = vadd.f32 %v1522_v32, %v539_v51  ;;  %v2730_v53 = vadd.f32 %v553_v48, %v2668_v55  ;;  %v1524_v55 = vld [vmem:[%s2880_s2 + $0x7] ss:$0 sm:$0xff]  ;;  %v746_v32 = vld [vmem:[#allocation2 + $0x2d8] sm:$0xff]  ;;  %v2363_v48 = vpack.c.bf16 %v750_v47, %v749_v46  ;;  %v864_v51 = vld [vmem:[#allocation2 + $0x310] sm:$0xff] }
 0x4e3   :  { %v556_v57 = vmul.f32 %v1523_v43, %v545_v50  ;;  %v2355_v42 = vpack.c.bf16 %v746_v32, %v745_v41  ;;  %v863_v50 = vld [vmem:[#allocation2 + $0x308] sm:$0xff]  ;;  %v876_v32 = vld [vmem:[#allocation2 + $0x370] sm:$0xff] }
 0x4e4   :  { %v555_v58 = vmul.f32 %v1523_v43, %v540_v52  ;;  %1941 = vmatprep.mubr.f32.mxu0 %v2730_v53  ;;  %v747_v43 = vld [vmem:[#allocation2 + $0x2e0] sm:$0xff]  ;;  %v2367_v52 = vpack.c.bf16 %v863_v50, %v862_v49  ;;  %v984_v46 = vld [vmem:[#allocation2 + $0x390] sm:$0xff] }
 0x4e5   :  { %1942 = vmatmul.mubr.f32.vlgmr.msra.gmra.mrb[8].mxu0 %v2733_v54  ;;  %v2741_v62 = vadd.f32 %v556_v57, %v2676_v60  ;;  %v735_v60 = vld [vmem:[#allocation2 + $0x280] sm:$0xff]  ;;  %v2359_v45 = vpack.c.bf16 %v748_v44, %v747_v43  ;;  %v865_v57 = vld [vmem:[#allocation2 + $0x318] sm:$0xff] }
 0x4e6   :  { %v2738_v61 = vadd.f32 %v555_v58, %v2674_v59  ;;  %v2335_v7 = vpack.c.bf16 %v736_v5, %v735_v60  ;;  %v2371_v58 = vpack.c.bf16 %v865_v57, %v864_v51  ;;  %2368 = vmatprep.subr.bf16.mxu0 %v2367_v52  ;;  %v982_v44 = vld [vmem:[#allocation2 + $0x380] sm:$0xff]  ;;  %v987_v51 = vld [vmem:[#allocation2 + $0x3a8] sm:$0xff]  ;;  %v988_v57 = vld [vmem:[#allocation2 + $0x3b0] sm:$0xff] }
 0x4e7   :  { %2370 = vmatpush3.bf16.msra.mxu0 %v2367_v52  ;;  %v986_v50 = vld [vmem:[#allocation2 + $0x3a0] sm:$0xff] }
 0x4e8   :  { %1944 = vmatprep.mubr.f32.mxu0 %v2738_v61  ;;  %2336 = vmatprep.subr.bf16.mxu1 %v2335_v7  ;;  %v2407_v52 = vpack.c.bf16 %v987_v51, %v986_v50 }
 0x4e9   :  { %1945 = vmatmul.mubr.f32.gmra.mrb[10].mxu0 %v2741_v62  ;;  %2338 = vmatpush3.bf16.msra.mxu1 %v2335_v7 }
 0x4ea   :  { %2340 = vmatprep.subr.bf16.mxu1 %v2339_v9  ;;  %2372 = vmatprep.subr.bf16.mxu0 %v2371_v58 }
 0x4eb   :  { %2374 = vmatpush3.bf16.msra.mxu0 %v2371_v58  ;;  %v989_v58 = vld [vmem:[#allocation2 + $0x3b8] sm:$0xff] }
 0x4ed   :  { %2342 = vmatpush3.bf16.msra.mxu1 %v2339_v9 }
 0x4ee   :  { %2344 = vmatprep.subr.bf16.mxu1 %v2343_v12 }
 0x4f1   :  { %2346 = vmatpush3.bf16.msra.mxu1 %v2343_v12 }
 0x4f2   :  { %2348 = vmatprep.subr.bf16.mxu1 %v2347_v27 }
 0x4f5   :  { %2350 = vmatpush3.bf16.msra.mxu1 %v2347_v27  ;;  %v873_v27 = vld [vmem:[#allocation2 + $0x358] sm:$0xff] }
 0x4f6   :  { %2352 = vmatprep.subr.bf16.mxu1 %v2351_v40 }
 0x4f9   :  { %2354 = vmatpush3.bf16.msra.mxu1 %v2351_v40  ;;  %v875_v40 = vld [vmem:[#allocation2 + $0x368] sm:$0xff] }
 0x4fa   :  { %2356 = vmatprep.subr.bf16.mxu1 %v2355_v42  ;;  %v2391_v41 = vpack.c.bf16 %v875_v40, %v874_v39  ;;  %v1528_v39 = vld [vmem:[%s2880_s2 + $0xb] ss:$0 sm:$0xff] }
 0x4fd   :  { %2358 = vmatpush3.bf16.msra.mxu1 %v2355_v42  ;;  %v877_v42 = vld [vmem:[#allocation2 + $0x378] sm:$0xff] }
 0x4fe   :  { %2360 = vmatprep.subr.bf16.mxu1 %v2359_v45  ;;  %v2395_v43 = vpack.c.bf16 %v877_v42, %v876_v32 }
 0x501   :  { %2362 = vmatpush3.bf16.msra.mxu1 %v2359_v45  ;;  %v983_v45 = vld [vmem:[#allocation2 + $0x388] sm:$0xff] }
 0x502   :  { %2364 = vmatprep.subr.bf16.mxu1 %v2363_v48  ;;  %v2399_v47 = vpack.c.bf16 %v983_v45, %v982_v44 }
 0x505   :  { %2366 = vmatpush3.bf16.msra.mxu1 %v2363_v48  ;;  %v985_v48 = vld [vmem:[#allocation2 + $0x398] sm:$0xff] }
 0x506   :  { %v2403_v49 = vpack.c.bf16 %v985_v48, %v984_v46  ;;  %2400 = vmatprep.subr.bf16.mxu1 %v2399_v47 }
 0x5b8   :  { %v1943_v56 = vpop.f32.mrb[8].mxu0 }
 0x5b9   :  { %v655_v63 = vadd.f32 %v1943_v56, %v1524_v55  ;;  %v649_v0 = vpop.f32.mrb[9].mxu0  ;;  %v867_v56 = vld [vmem:[#allocation2 + $0x328] sm:$0xff] }
 0x5ba   :  { %v650_v1 = vadd.f32 %v1524_v55, %v649_v0 }
 0x5bb   :  { %670 = vadd.xlane.f32.xlu1 %v655_v63 }
 0x5bc   :  { %668 = vadd.xlane.f32.xlu0 %v650_v1  ;;  %v1946_v2 = vpop.f32.mrb[10].mxu0 }
 0x5bd   :  { %v665_v59 = vadd.f32 %v1946_v2, %v1524_v55  ;;  %v659_v3 = vpop.f32.mrb[11].mxu0 }
 0x5be   :  { %v660_v4 = vadd.f32 %v1524_v55, %v659_v3  ;;  %v866_v55 = vld [vmem:[#allocation2 + $0x320] sm:$0xff] }
 0x5bf   :  { %674 = vadd.xlane.f32.xlu1 %v665_v59 }
 0x5c0   :  { %672 = vadd.xlane.f32.xlu0 %v660_v4 }
 0x648   :  { %v671_v14 = vpop.xlane.xlu1 %670 }
 0x649   :  { %v677_v15 = vmul.f32 0.041666668, %v671_v14  ;;  %v669_v16 = vpop.xlane.xlu0 %668 }
 0x64a   :  { %v676_v17 = vmul.f32 0.041666668, %v669_v16  ;;  %v1526_v16 = vld [vmem:[%s2880_s2 + $0x9] ss:$0 sm:$0xff] }
 0x64b   :  { %v681_v18 = vsub.f32 %v655_v63, %v677_v15  ;;  %v2375_v63 = vpack.c.bf16 %v867_v56, %v866_v55  ;;  %v2411_v55 = vpack.c.bf16 %v989_v58, %v988_v57  ;;  %v990_v56 = vld [vmem:[#allocation2 + $0x3c0] sm:$0xff] }
 0x64c   :  { %v680_v19 = vsub.f32 %v650_v1, %v676_v17  ;;  %v675_v20 = vpop.xlane.xlu1 %674 }
 0x64d   :  { %v679_v22 = vmul.f32 0.041666668, %v675_v20  ;;  %v673_v23 = vpop.xlane.xlu0 %672  ;;  %v2750_v24 = vsel %vm140_vm0, %v681_v18, 0.0  ;;  %2376 = vmatprep.subr.bf16.mxu0 %v2375_v63 }
 0x64e   :  { %v678_v25 = vmul.f32 0.041666668, %v673_v23  ;;  %v689_v26 = vmul.f32 %v2750_v24, %v2750_v24  ;;  %v2756_v29 = vsel %vm140_vm0, %v680_v19, 0.0  ;;  %2378 = vmatpush3.bf16.msra.mxu0 %v2375_v63  ;;  %v991_v63 = vld [vmem:[#allocation2 + $0x3c8] sm:$0xff] }
 0x64f   :  { %v683_v30 = vsub.f32 %v665_v59, %v679_v22  ;;  %v688_v31 = vmul.f32 %v2756_v29, %v2756_v29 }
 0x650   :  { %v682_v21 = vsub.f32 %v660_v4, %v678_v25  ;;  %694 = vadd.xlane.f32.xlu1 %v689_v26 }
 0x651   :  { %692 = vadd.xlane.f32.xlu0 %v688_v31  ;;  %v2762_v33 = vsel %vm140_vm0, %v683_v30, 0.0 }
 0x652   :  { %v691_v34 = vmul.f32 %v2762_v33, %v2762_v33  ;;  %v2768_v35 = vsel %vm140_vm0, %v682_v21, 0.0  ;;  %v868_v21 = vld [vmem:[#allocation2 + $0x330] sm:$0xff] }
 0x653   :  { %v690_v36 = vmul.f32 %v2768_v35, %v2768_v35 }
 0x654   :  { %698 = vadd.xlane.f32.xlu1 %v691_v34  ;;  %v869_v34 = vld [vmem:[#allocation2 + $0x338] sm:$0xff] }
 0x655   :  { %696 = vadd.xlane.f32.xlu0 %v690_v36  ;;  %v2379_v36 = vpack.c.bf16 %v869_v34, %v868_v21 }
 0x657   :  { %2380 = vmatprep.subr.bf16.mxu0 %v2379_v36 }
 0x658   :  { %2382 = vmatpush3.bf16.msra.mxu0 %v2379_v36 }
 0x6dd   :  { %v695_v0 = vpop.xlane.xlu1 %694 }
 0x6de   :  { %v701_v1 = vmul.f32 0.041666668, %v695_v0  ;;  %v693_v2 = vpop.xlane.xlu0 %692  ;;  %v2415_v0 = vpack.c.bf16 %v991_v63, %v990_v56 }
 0x6df   :  { %v700_v59 = vmul.f32 0.041666668, %v693_v2  ;;  %v993_v2 = vld [vmem:[#allocation2 + $0x3d8] sm:$0xff] }
 0x6e0   :  { %v705_v3 = vadd.f32 1e-05, %v701_v1  ;;  %v992_v1 = vld [vmem:[#allocation2 + $0x3d0] sm:$0xff] }
 0x6e1   :  { %v704_v4 = vadd.f32 1e-05, %v700_v59  ;;  %v699_v60 = vpop.xlane.xlu1 %698  ;;  %v2419_v59 = vpack.c.bf16 %v993_v2, %v992_v1 }
 0x6e2   :  { %2562 = vrsqrt.f32 %v705_v3  ;;  %v703_v5 = vmul.f32 0.041666668, %v699_v60  ;;  %v697_v6 = vpop.xlane.xlu0 %696  ;;  %v1527_v3 = vld [vmem:[%s2880_s2 + $0xa] ss:$0 sm:$0xff] }
 0x6e3   :  { %2564 = vrsqrt.f32 %v704_v4  ;;  %v702_v7 = vmul.f32 0.041666668, %v697_v6 }
 0x6e4   :  { %v707_v8 = vadd.f32 1e-05, %v703_v5 }
 0x6e5   :  { %v706_v9 = vadd.f32 1e-05, %v702_v7 }
 0x6e6   :  { %2566 = vrsqrt.f32 %v707_v8 }
 0x6e7   :  { %2568 = vrsqrt.f32 %v706_v9 }
 0x6ec   :  { %v2563_v10 = vpop.eup %2562 }
 0x6ed   :  { %v2565_v12 = vpop.eup %2564  ;;  %v713_v14 = vmul.f32 %v2563_v10, %v2750_v24 }
 0x6ee   :  { %v712_v15 = vmul.f32 %v2565_v12, %v2756_v29 }
 0x6ef   :  { %v722_v17 = vmul.f32 %v1525_v11, %v713_v14 }
 0x6f0   :  { %v2567_v18 = vpop.eup %2566  ;;  %v721_v19 = vmul.f32 %v1525_v11, %v712_v15 }
 0x6f1   :  { %v2569_v20 = vpop.eup %2568  ;;  %v715_v22 = vmul.f32 %v2567_v18, %v2762_v33  ;;  %v731_v26 = vadd.f32 %v1526_v16, %v722_v17  ;;  %v2383_v33 = vpack.c.bf16 %v871_v28, %v870_v37  ;;  %v994_v37 = vld [vmem:[#allocation2 + $0x3e0] sm:$0xff]  ;;  %v995_v28 = vld [vmem:[#allocation2 + $0x3e8] sm:$0xff] }
 0x6f2   :  { %v730_v23 = vadd.f32 %v1526_v16, %v721_v19  ;;  %v714_v25 = vmul.f32 %v2569_v20, %v2768_v35  ;;  %v872_v35 = vld [vmem:[#allocation2 + $0x350] sm:$0xff] }
 0x6f3   :  { %v724_v30 = vmul.f32 %v1525_v11, %v715_v22  ;;  %2384 = vmatprep.subr.bf16.mxu0 %v2383_v33  ;;  %v2387_v38 = vpack.c.bf16 %v873_v27, %v872_v35  ;;  %v996_v35 = vld [vmem:[#allocation2 + $0x3f0] sm:$0xff]  ;;  %v997_v27 = vld [vmem:[#allocation2 + $0x3f8] sm:$0xff] }
 0x6f4   :  { %1979 = vmatprep.mubr.f32.mxu1 %v730_v23  ;;  %v723_v31 = vmul.f32 %v1525_v11, %v714_v25  ;;  %2386 = vmatpush3.bf16.msra.mxu0 %v2383_v33  ;;  %v2423_v33 = vpack.c.bf16 %v995_v28, %v994_v37  ;;  %v1162_v37 = vld [vmem:[#allocation2 + $0x438] sm:$0xff] }
 0x6f5   :  { %1980 = vmatmul.mubr.f32.vlgmr.msra.gmra.mrb[8].mxu1 %v731_v26  ;;  %v733_v29 = vadd.f32 %v1526_v16, %v724_v30  ;;  %2388 = vmatprep.subr.bf16.mxu0 %v2387_v38 }
 0x6f6   :  { %v732_v24 = vadd.f32 %v1526_v16, %v723_v31  ;;  %2402 = vmatpush3.bf16.msra.mxu1 %v2399_v47 }
 0x6f7   :  { %2404 = vmatprep.subr.bf16.mxu1 %v2403_v49 }
 0x6f8   :  { %1982 = vmatprep.mubr.f32.mxu1 %v732_v24  ;;  %2390 = vmatpush3.bf16.msra.mxu0 %v2387_v38  ;;  %v2427_v38 = vpack.c.bf16 %v997_v27, %v996_v35  ;;  %v1164_v35 = vld [vmem:[#allocation2 + $0x448] sm:$0xff] }
 0x6f9   :  { %1983 = vmatmul.mubr.f32.gmra.mrb[10].mxu1 %v733_v29  ;;  %2392 = vmatprep.subr.bf16.mxu0 %v2391_v41 }
 0x6fa   :  { %2406 = vmatpush3.bf16.msra.mxu1 %v2403_v49 }
 0x6fb   :  { %2408 = vmatprep.subr.bf16.mxu1 %v2407_v52 }
 0x6fc   :  { %2394 = vmatpush3.bf16.msra.mxu0 %v2391_v41  ;;  %v1529_v41 = vld [vmem:[%s2880_s2 + $0xc] ss:$0 sm:$0xff] }
 0x6fd   :  { %2396 = vmatprep.subr.bf16.mxu0 %v2395_v43 }
 0x6fe   :  { %2410 = vmatpush3.bf16.msra.mxu1 %v2407_v52 }
 0x6ff   :  { %2412 = vmatprep.subr.bf16.mxu1 %v2411_v55 }
 0x700   :  { %2398 = vmatpush3.bf16.msra.mxu0 %v2395_v43 }
 0x702   :  { %2414 = vmatpush3.bf16.msra.mxu1 %v2411_v55 }
 0x703   :  { %2416 = vmatprep.subr.bf16.mxu1 %v2415_v0 }
 0x706   :  { %2418 = vmatpush3.bf16.msra.mxu1 %v2415_v0 }
 0x707   :  { %2420 = vmatprep.subr.bf16.mxu1 %v2419_v59 }
 0x70a   :  { %2422 = vmatpush3.bf16.msra.mxu1 %v2419_v59 }
 0x70b   :  { %2424 = vmatprep.subr.bf16.mxu1 %v2423_v33 }
 0x70e   :  { %2426 = vmatpush3.bf16.msra.mxu1 %v2423_v33  ;;  %v1163_v33 = vld [vmem:[#allocation2 + $0x440] sm:$0xff] }
 0x70f   :  { %2428 = vmatprep.subr.bf16.mxu1 %v2427_v38  ;;  %v2447_v27 = vpack.c.bf16 %v1164_v35, %v1163_v33  ;;  %v1294_v33 = vld [vmem:[#allocation2 + $0x4e0] sm:$0xff]  ;;  %v1295_v35 = vld [vmem:[#allocation2 + $0x4e8] sm:$0xff] }
 0x712   :  { %2430 = vmatpush3.bf16.msra.mxu1 %v2427_v38  ;;  %v1165_v38 = vld [vmem:[#allocation2 + $0x450] sm:$0xff] }
 0x7c8   :  { %v1981_v4 = vpop.f32.mrb[8].mxu1 }
 0x7c9   :  { %v828_v60 = vadd.f32 %v1981_v4, %v1527_v3  ;;  %v822_v5 = vpop.f32.mrb[9].mxu1  ;;  %v1157_v4 = vld [vmem:[#allocation2 + $0x410] sm:$0xff] }
 0x7ca   :  { %v823_v6 = vadd.f32 %v1527_v3, %v822_v5  ;;  %v1158_v5 = vld [vmem:[#allocation2 + $0x418] sm:$0xff] }
 0x7cb   :  { %v846_v7 = vmul.f32 0.70710677, %v828_v60  ;;  %v842_v22 = vmul.f32 0.5, %v828_v60 }
 0x7cc   :  { %v845_v8 = vmul.f32 0.70710677, %v823_v6  ;;  %v1984_v9 = vpop.f32.mrb[10].mxu1  ;;  %v841_v19 = vmul.f32 0.5, %v823_v6  ;;  %v2435_v6 = vpack.c.bf16 %v1158_v5, %v1157_v4 }
 0x7cd   :  { %2570 = verf.f32 %v846_v7  ;;  %v838_v10 = vadd.f32 %v1984_v9, %v1527_v3  ;;  %v832_v11 = vpop.f32.mrb[11].mxu1  ;;  %v1159_v7 = vld [vmem:[#allocation2 + $0x420] sm:$0xff] }
 0x7ce   :  { %2572 = verf.f32 %v845_v8  ;;  %v833_v12 = vadd.f32 %v1527_v3, %v832_v11  ;;  %v1156_v3 = vld [vmem:[#allocation2 + $0x408] sm:$0xff] }
 0x7cf   :  { %v848_v14 = vmul.f32 0.70710677, %v838_v10  ;;  %v844_v21 = vmul.f32 0.5, %v838_v10  ;;  %v1160_v8 = vld [vmem:[#allocation2 + $0x428] sm:$0xff] }
 0x7d0   :  { %v847_v15 = vmul.f32 0.70710677, %v833_v12  ;;  %v843_v24 = vmul.f32 0.5, %v833_v12  ;;  %v2439_v9 = vpack.c.bf16 %v1160_v8, %v1159_v7  ;;  %v1531_v7 = vld [vmem:[%s2880_s2 + $0xe] ss:$0 sm:$0xff] }
 0x7d1   :  { %2574 = verf.f32 %v848_v14 }
 0x7d2   :  { %2576 = verf.f32 %v847_v15 }
 0x7d7   :  { %v2571_v16 = vpop.eup %2570 }
 0x7d8   :  { %v2573_v17 = vpop.eup %2572  ;;  %v854_v18 = vadd.f32 1.0, %v2571_v16 }
 0x7d9   :  { %v853_v20 = vadd.f32 1.0, %v2573_v17 }
 0x7da   :  { %v858_v30 = vmul.f32 %v854_v18, %v842_v22 }
 0x7db   :  { %v2575_v23 = vpop.eup %2574  ;;  %v857_v25 = vmul.f32 %v853_v20, %v841_v19 }
 0x7dc   :  { %v2577_v26 = vpop.eup %2576  ;;  %v856_v31 = vadd.f32 1.0, %v2575_v23 }
 0x7dd   :  { %v855_v29 = vadd.f32 1.0, %v2577_v26  ;;  %2017 = vmatprep.mubr.f32.mxu0 %v857_v25 }
 0x7de   :  { %2018 = vmatmul.mubr.f32.vlgmr.msra.gmra.mrb[12].mxu0 %v858_v30  ;;  %v860_v36 = vmul.f32 %v856_v31, %v844_v21 }
 0x7df   :  { %v859_v34 = vmul.f32 %v855_v29, %v843_v24 }
 0x7e1   :  { %2020 = vmatprep.mubr.f32.mxu0 %v859_v34 }
 0x7e2   :  { %2021 = vmatmul.mubr.f32.gmra.mrb[14].mxu0 %v860_v36  ;;  %v1161_v36 = vld [vmem:[#allocation2 + $0x430] sm:$0xff] }
 0x7e3   :  { %v2443_v28 = vpack.c.bf16 %v1162_v37, %v1161_v36  ;;  %v1291_v36 = vld [vmem:[#allocation2 + $0x4c8] sm:$0xff]  ;;  %v1293_v37 = vld [vmem:[#allocation2 + $0x4d8] sm:$0xff] }
 0x8b1   :  { %v2019_v40 = vpop.f32.mrb[12].mxu0 }
 0x8b2   :  { %v955_v32 = vadd.f32 %v2019_v40, %v1528_v39  ;;  %v949_v42 = vpop.f32.mrb[13].mxu0  ;;  %v1167_v40 = vld [vmem:[#allocation2 + $0x460] sm:$0xff] }
 0x8b3   :  { %v950_v43 = vadd.f32 %v1528_v39, %v949_v42  ;;  %v1169_v42 = vld [vmem:[#allocation2 + $0x470] sm:$0xff] }
 0x8b4   :  { %v974_v44 = vmul.f32 %v1529_v41, %v955_v32 }
 0x8b5   :  { %v973_v45 = vmul.f32 %v1529_v41, %v950_v43  ;;  %v2022_v46 = vpop.f32.mrb[14].mxu0  ;;  %v1170_v43 = vld [vmem:[#allocation2 + $0x478] sm:$0xff] }
 0x8b6   :  { %v965_v47 = vadd.f32 %v2022_v46, %v1528_v39  ;;  %v959_v48 = vpop.f32.mrb[15].mxu0  ;;  %v2795_v51 = vadd.f32 %v974_v44, %v2733_v54  ;;  %v2459_v44 = vpack.c.bf16 %v1170_v43, %v1169_v42  ;;  %v1283_v46 = vld [vmem:[#allocation2 + $0x488] sm:$0xff]  ;;  %v1405_v43 = vld [vmem:[#allocation2 + $0x518] sm:$0xff] }
 0x8b7   :  { %v960_v49 = vadd.f32 %v1528_v39, %v959_v48  ;;  %v2792_v50 = vadd.f32 %v973_v45, %v2730_v53  ;;  %v1530_v53 = vld [vmem:[%s2880_s2 + $0xd] ss:$0 sm:$0xff]  ;;  %v1166_v39 = vld [vmem:[#allocation2 + $0x458] sm:$0xff]  ;;  %v1282_v45 = vld [vmem:[#allocation2 + $0x480] sm:$0xff] }
 0x8b8   :  { %v976_v52 = vmul.f32 %v1529_v41, %v965_v47  ;;  %v2451_v13 = vpack.c.bf16 %v1166_v39, %v1165_v38  ;;  %v1284_v47 = vld [vmem:[#allocation2 + $0x490] sm:$0xff]  ;;  %v2463_v48 = vpack.c.bf16 %v1283_v46, %v1282_v45  ;;  %v1297_v39 = vld [vmem:[#allocation2 + $0x4f8] sm:$0xff]  ;;  %v1406_v45 = vld [vmem:[#allocation2 + $0x520] sm:$0xff] }
 0x8b9   :  { %v975_v57 = vmul.f32 %v1529_v41, %v960_v49  ;;  %2055 = vmatprep.mubr.f32.mxu1 %v2792_v50  ;;  %v1168_v41 = vld [vmem:[#allocation2 + $0x468] sm:$0xff]  ;;  %v1285_v49 = vld [vmem:[#allocation2 + $0x498] sm:$0xff]  ;;  %v1296_v38 = vld [vmem:[#allocation2 + $0x4f0] sm:$0xff] }
 0x8ba   :  { %2056 = vmatmul.mubr.f32.vlgmr.msra.gmra.mrb[12].mxu1 %v2795_v51  ;;  %v2803_v55 = vadd.f32 %v976_v52, %v2741_v62  ;;  %v1155_v62 = vld [vmem:[#allocation2 + $0x400] sm:$0xff]  ;;  %v2455_v32 = vpack.c.bf16 %v1168_v41, %v1167_v40  ;;  %v2467_v52 = vpack.c.bf16 %v1285_v49, %v1284_v47  ;;  %2464 = vmatprep.subr.bf16.mxu1 %v2463_v48  ;;  %v1403_v41 = vld [vmem:[#allocation2 + $0x508] sm:$0xff]  ;;  %v1409_v49 = vld [vmem:[#allocation2 + $0x538] sm:$0xff] }
 0x8bb   :  { %v2800_v58 = vadd.f32 %v975_v57, %v2738_v61  ;;  %v2431_v60 = vpack.c.bf16 %v1156_v3, %v1155_v62  ;;  %v1286_v57 = vld [vmem:[#allocation2 + $0x4a0] sm:$0xff]  ;;  %2466 = vmatpush3.bf16.msra.mxu1 %v2463_v48  ;;  %v1407_v46 = vld [vmem:[#allocation2 + $0x528] sm:$0xff]  ;;  %v1408_v48 = vld [vmem:[#allocation2 + $0x530] sm:$0xff] }
 0x8bc   :  { %2468 = vmatprep.subr.bf16.mxu1 %v2467_v52  ;;  %v1402_v40 = vld [vmem:[#allocation2 + $0x500] sm:$0xff]  ;;  %v2503_v47 = vpack.c.bf16 %v1407_v46, %v1406_v45 }
 0x8bd   :  { %2058 = vmatprep.mubr.f32.mxu1 %v2800_v58  ;;  %2432 = vmatprep.subr.bf16.mxu0 %v2431_v60  ;;  %v2495_v42 = vpack.c.bf16 %v1403_v41, %v1402_v40 }
 0x8be   :  { %2059 = vmatmul.mubr.f32.gmra.mrb[14].mxu1 %v2803_v55  ;;  %2434 = vmatpush3.bf16.msra.mxu0 %v2431_v60 }
 0x8bf   :  { %2436 = vmatprep.subr.bf16.mxu0 %v2435_v6  ;;  %2470 = vmatpush3.bf16.msra.mxu1 %v2467_v52  ;;  %v2507_v52 = vpack.c.bf16 %v1409_v49, %v1408_v48 }
 0x8c2   :  { %2438 = vmatpush3.bf16.msra.mxu0 %v2435_v6 }
 0x8c3   :  { %2440 = vmatprep.subr.bf16.mxu0 %v2439_v9 }
 0x8c6   :  { %2442 = vmatpush3.bf16.msra.mxu0 %v2439_v9 }
 0x8c7   :  { %2444 = vmatprep.subr.bf16.mxu0 %v2443_v28 }
 0x8ca   :  { %2446 = vmatpush3.bf16.msra.mxu0 %v2443_v28 }
 0x8cb   :  { %2448 = vmatprep.subr.bf16.mxu0 %v2447_v27 }
 0x8ce   :  { %2450 = vmatpush3.bf16.msra.mxu0 %v2447_v27  ;;  %v2487_v27 = vpack.c.bf16 %v1295_v35, %v1294_v33  ;;  %v1535_v35 = vld [vmem:[%s2880_s2 + $0x12] ss:$0 sm:$0xff] }
 0x8cf   :  { %2452 = vmatprep.subr.bf16.mxu0 %v2451_v13 }
 0x8d2   :  { %2454 = vmatpush3.bf16.msra.mxu0 %v2451_v13  ;;  %v2491_v13 = vpack.c.bf16 %v1297_v39, %v1296_v38 }
 0x8d3   :  { %2456 = vmatprep.subr.bf16.mxu0 %v2455_v32 }
 0x8d6   :  { %2458 = vmatpush3.bf16.msra.mxu0 %v2455_v32  ;;  %v1404_v32 = vld [vmem:[#allocation2 + $0x510] sm:$0xff] }
 0x8d7   :  { %2460 = vmatprep.subr.bf16.mxu0 %v2459_v44 }
 0x8da   :  { %2462 = vmatpush3.bf16.msra.mxu0 %v2459_v44  ;;  %v2844_v44 = vpack.c.bf16 %v1405_v43, %v1404_v32 }
 0x8db   :  { %2496 = vmatprep.subr.bf16.mxu0 %v2495_v42 }
 0x98d   :  { %v2057_v54 = vpop.f32.mrb[12].mxu1 }
 0x98e   :  { %v1075_v56 = vadd.f32 %v2057_v54, %v1530_v53  ;;  %v1069_v63 = vpop.f32.mrb[13].mxu1 }
 0x98f   :  { %v1070_v0 = vadd.f32 %v1530_v53, %v1069_v63 }
 0x990   :  { %1090 = vadd.xlane.f32.xlu1 %v1075_v56 }
 0x991   :  { %1088 = vadd.xlane.f32.xlu0 %v1070_v0  ;;  %v2060_v1 = vpop.f32.mrb[14].mxu1 }
 0x992   :  { %v1085_v61 = vadd.f32 %v2060_v1, %v1530_v53  ;;  %v1079_v2 = vpop.f32.mrb[15].mxu1 }
 0x993   :  { %v1080_v59 = vadd.f32 %v1530_v53, %v1079_v2  ;;  %v1287_v53 = vld [vmem:[#allocation2 + $0x4a8] sm:$0xff] }
 0x994   :  { %1094 = vadd.xlane.f32.xlu1 %v1085_v61  ;;  %v2471_v54 = vpack.c.bf16 %v1287_v53, %v1286_v57  ;;  %v1410_v57 = vld [vmem:[#allocation2 + $0x540] sm:$0xff]  ;;  %v1411_v53 = vld [vmem:[#allocation2 + $0x548] sm:$0xff] }
 0x995   :  { %1092 = vadd.xlane.f32.xlu0 %v1080_v59 }
 0x996   :  { %2472 = vmatprep.subr.bf16.mxu1 %v2471_v54 }
 0x997   :  { %2474 = vmatpush3.bf16.msra.mxu1 %v2471_v54  ;;  %v2511_v54 = vpack.c.bf16 %v1411_v53, %v1410_v57 }
 0xa1d   :  { %v1091_v10 = vpop.xlane.xlu1 %1090 }
 0xa1e   :  { %v1097_v11 = vmul.f32 0.041666668, %v1091_v10  ;;  %v1089_v12 = vpop.xlane.xlu0 %1088 }
 0xa1f   :  { %v1096_v14 = vmul.f32 0.041666668, %v1089_v12 }
 0xa20   :  { %v1101_v15 = vsub.f32 %v1075_v56, %v1097_v11  ;;  %v1532_v11 = vld [vmem:[%s2880_s2 + $0xf] ss:$0 sm:$0xff] }
 0xa21   :  { %v1100_v16 = vsub.f32 %v1070_v0, %v1096_v14  ;;  %v1095_v17 = vpop.xlane.xlu1 %1094 }
 0xa22   :  { %v1099_v18 = vmul.f32 0.041666668, %v1095_v17  ;;  %v1093_v19 = vpop.xlane.xlu0 %1092  ;;  %v2812_v20 = vsel %vm140_vm0, %v1101_v15, 0.0 }
 0xa23   :  { %v1098_v22 = vmul.f32 0.041666668, %v1093_v19  ;;  %v1109_v23 = vmul.f32 %v2812_v20, %v2812_v20  ;;  %v2818_v25 = vsel %vm140_vm0, %v1100_v16, 0.0 }
 0xa24   :  { %v1103_v26 = vsub.f32 %v1085_v61, %v1099_v18  ;;  %v1108_v30 = vmul.f32 %v2818_v25, %v2818_v25 }
 0xa25   :  { %v1102_v31 = vsub.f32 %v1080_v59, %v1098_v22  ;;  %1114 = vadd.xlane.f32.xlu1 %v1109_v23 }
 0xa26   :  { %1112 = vadd.xlane.f32.xlu0 %v1108_v30  ;;  %v2824_v24 = vsel %vm140_vm0, %v1103_v26, 0.0  ;;  %v1288_v30 = vld [vmem:[#allocation2 + $0x4b0] sm:$0xff] }
 0xa27   :  { %v1111_v29 = vmul.f32 %v2824_v24, %v2824_v24  ;;  %v2830_v21 = vsel %vm140_vm0, %v1102_v31, 0.0  ;;  %v1289_v31 = vld [vmem:[#allocation2 + $0x4b8] sm:$0xff] }
 0xa28   :  { %v1110_v34 = vmul.f32 %v2830_v21, %v2830_v21 }
 0xa29   :  { %1118 = vadd.xlane.f32.xlu1 %v1111_v29  ;;  %v2475_v29 = vpack.c.bf16 %v1289_v31, %v1288_v30 }
 0xa2a   :  { %1116 = vadd.xlane.f32.xlu0 %v1110_v34  ;;  %v1290_v34 = vld [vmem:[#allocation2 + $0x4c0] sm:$0xff] }
 0xa2b   :  { %2476 = vmatprep.subr.bf16.mxu1 %v2475_v29 }
 0xa2c   :  { %2478 = vmatpush3.bf16.msra.mxu1 %v2475_v29  ;;  %v1414_v29 = vld [vmem:[#allocation2 + $0x560] sm:$0xff] }
 0xab2   :  { %v1115_v56 = vpop.xlane.xlu1 %1114 }
 0xab3   :  { %v1121_v63 = vmul.f32 0.041666668, %v1115_v56  ;;  %v1113_v0 = vpop.xlane.xlu0 %1112  ;;  %v1412_v56 = vld [vmem:[#allocation2 + $0x550] sm:$0xff] }
 0xab4   :  { %v1120_v1 = vmul.f32 0.041666668, %v1113_v0 }
 0xab5   :  { %v1125_v61 = vadd.f32 1e-05, %v1121_v63  ;;  %v1413_v63 = vld [vmem:[#allocation2 + $0x558] sm:$0xff] }
 0xab6   :  { %v1124_v2 = vadd.f32 1e-05, %v1120_v1  ;;  %v1119_v59 = vpop.xlane.xlu1 %1118  ;;  %v2515_v0 = vpack.c.bf16 %v1413_v63, %v1412_v56  ;;  %v1533_v1 = vld [vmem:[%s2880_s2 + $0x10] ss:$0 sm:$0xff] }
 0xab7   :  { %2578 = vrsqrt.f32 %v1125_v61  ;;  %v1123_v62 = vmul.f32 0.041666668, %v1119_v59  ;;  %v1117_v3 = vpop.xlane.xlu0 %1116 }
 0xab8   :  { %2580 = vrsqrt.f32 %v1124_v2  ;;  %v1122_v4 = vmul.f32 0.041666668, %v1117_v3 }
 0xab9   :  { %v1127_v60 = vadd.f32 1e-05, %v1123_v62 }
 0xaba   :  { %v1126_v5 = vadd.f32 1e-05, %v1122_v4 }
 0xabb   :  { %2582 = vrsqrt.f32 %v1127_v60 }
 0xabc   :  { %2584 = vrsqrt.f32 %v1126_v5 }
 0xac1   :  { %v2579_v6 = vpop.eup %2578 }
 0xac2   :  { %v2581_v8 = vpop.eup %2580  ;;  %v1133_v9 = vmul.f32 %v2579_v6, %v2812_v20 }
 0xac3   :  { %v1132_v10 = vmul.f32 %v2581_v8, %v2818_v25 }
 0xac4   :  { %v1142_v12 = vmul.f32 %v1531_v7, %v1133_v9 }
 0xac5   :  { %v2583_v14 = vpop.eup %2582  ;;  %v1141_v15 = vmul.f32 %v1531_v7, %v1132_v10 }
 0xac6   :  { %v2585_v16 = vpop.eup %2584  ;;  %v1135_v17 = vmul.f32 %v2583_v14, %v2824_v24  ;;  %v1151_v22 = vadd.f32 %v1532_v11, %v1142_v12  ;;  %v2479_v24 = vpack.c.bf16 %v1291_v36, %v1290_v34  ;;  %v1415_v34 = vld [vmem:[#allocation2 + $0x568] sm:$0xff] }
 0xac7   :  { %v1150_v18 = vadd.f32 %v1532_v11, %v1141_v15  ;;  %v1134_v19 = vmul.f32 %v2585_v16, %v2830_v21  ;;  %v1292_v21 = vld [vmem:[#allocation2 + $0x4d0] sm:$0xff]  ;;  %v2519_v36 = vpack.c.bf16 %v1415_v34, %v1414_v29 }
 0xac8   :  { %v1144_v23 = vmul.f32 %v1531_v7, %v1135_v17  ;;  %2480 = vmatprep.subr.bf16.mxu1 %v2479_v24  ;;  %v2483_v28 = vpack.c.bf16 %v1293_v37, %v1292_v21  ;;  %v1417_v21 = vld [vmem:[#allocation2 + $0x578] sm:$0xff] }
 0xac9   :  { %2093 = vmatprep.mubr.f32.mxu0 %v1150_v18  ;;  %v1143_v26 = vmul.f32 %v1531_v7, %v1134_v19  ;;  %2482 = vmatpush3.bf16.msra.mxu1 %v2479_v24  ;;  %v1416_v24 = vld [vmem:[#allocation2 + $0x570] sm:$0xff] }
 0xaca   :  { %2094 = vmatmul.mubr.f32.vlgmr.msra.gmra.mrb[16].mxu0 %v1151_v22  ;;  %v1153_v25 = vadd.f32 %v1532_v11, %v1144_v23  ;;  %2484 = vmatprep.subr.bf16.mxu1 %v2483_v28  ;;  %v2523_v37 = vpack.c.bf16 %v1417_v21, %v1416_v24 }
 0xacb   :  { %v1152_v20 = vadd.f32 %v1532_v11, %v1143_v26  ;;  %2498 = vmatpush3.bf16.msra.mxu0 %v2495_v42 }
 0xacc   :  { %2500 = vmatprep.subr.bf16.mxu0 %v2844_v44 }
 0xacd   :  { %2096 = vmatprep.mubr.f32.mxu0 %v1152_v20  ;;  %2486 = vmatpush3.bf16.msra.mxu1 %v2483_v28  ;;  %v1534_v28 = vld [vmem:[%s2880_s2 + $0x11] ss:$0 sm:$0xff] }
 0xace   :  { %2097 = vmatmul.mubr.f32.gmra.mrb[18].mxu0 %v1153_v25  ;;  %2488 = vmatprep.subr.bf16.mxu1 %v2487_v27 }
 0xacf   :  { %2502 = vmatpush3.bf16.msra.mxu0 %v2844_v44 }
 0xad0   :  { %2504 = vmatprep.subr.bf16.mxu0 %v2503_v47 }
 0xad1   :  { %2490 = vmatpush3.bf16.msra.mxu1 %v2487_v27 }
 0xad2   :  { %2492 = vmatprep.subr.bf16.mxu1 %v2491_v13 }
 0xad3   :  { %2506 = vmatpush3.bf16.msra.mxu0 %v2503_v47 }
 0xad4   :  { %2508 = vmatprep.subr.bf16.mxu0 %v2507_v52 }
 0xad5   :  { %2494 = vmatpush3.bf16.msra.mxu1 %v2491_v13 }
 0xad6   :  { %2527 = vmatprep.subr.bf16.mxu1 %v2495_v42 }
 0xad7   :  { %2510 = vmatpush3.bf16.msra.mxu0 %v2507_v52 }
 0xad8   :  { %2512 = vmatprep.subr.bf16.mxu0 %v2511_v54 }
 0xadb   :  { %2514 = vmatpush3.bf16.msra.mxu0 %v2511_v54 }
 0xadc   :  { %2516 = vmatprep.subr.bf16.mxu0 %v2515_v0 }
 0xadf   :  { %2518 = vmatpush3.bf16.msra.mxu0 %v2515_v0 }
 0xae0   :  { %2520 = vmatprep.subr.bf16.mxu0 %v2519_v36 }
 0xae3   :  { %2522 = vmatpush3.bf16.msra.mxu0 %v2519_v36 }
 0xae4   :  { %2524 = vmatprep.subr.bf16.mxu0 %v2523_v37 }
 0xae7   :  { %2526 = vmatpush3.bf16.msra.mxu0 %v2523_v37 }
 0xb9d   :  { %v2095_v61 = vpop.f32.mrb[16].mxu0 }
 0xb9e   :  { %v1248_v2 = vadd.f32 %v2095_v61, %v1533_v1  ;;  %v1242_v59 = vpop.f32.mrb[17].mxu0 }
 0xb9f   :  { %v1243_v62 = vadd.f32 %v1533_v1, %v1242_v59 }
 0xba0   :  { %v1266_v3 = vmul.f32 0.70710677, %v1248_v2  ;;  %v1262_v16 = vmul.f32 0.5, %v1248_v2 }
 0xba1   :  { %v1265_v4 = vmul.f32 0.70710677, %v1243_v62  ;;  %v2098_v60 = vpop.f32.mrb[18].mxu0  ;;  %v1261_v14 = vmul.f32 0.5, %v1243_v62 }
 0xba2   :  { %2586 = verf.f32 %v1266_v3  ;;  %v1258_v5 = vadd.f32 %v2098_v60, %v1533_v1  ;;  %v1252_v6 = vpop.f32.mrb[19].mxu0 }
 0xba3   :  { %2588 = verf.f32 %v1265_v4  ;;  %v1253_v7 = vadd.f32 %v1533_v1, %v1252_v6 }
 0xba4   :  { %v1268_v8 = vmul.f32 0.70710677, %v1258_v5  ;;  %v1264_v25 = vmul.f32 0.5, %v1258_v5 }
 0xba5   :  { %v1267_v9 = vmul.f32 0.70710677, %v1253_v7  ;;  %v1263_v26 = vmul.f32 0.5, %v1253_v7 }
 0xba6   :  { %2590 = verf.f32 %v1268_v8 }
 0xba7   :  { %2592 = verf.f32 %v1267_v9 }
 0xbac   :  { %v2587_v10 = vpop.eup %2586 }
 0xbad   :  { %v2589_v11 = vpop.eup %2588  ;;  %v1274_v12 = vadd.f32 1.0, %v2587_v10 }
 0xbae   :  { %v1273_v15 = vadd.f32 1.0, %v2589_v11 }
 0xbaf   :  { %v1278_v22 = vmul.f32 %v1274_v12, %v1262_v16 }
 0xbb0   :  { %v2591_v17 = vpop.eup %2590  ;;  %v1277_v18 = vmul.f32 %v1273_v15, %v1261_v14 }
 0xbb1   :  { %v2593_v19 = vpop.eup %2592  ;;  %v1276_v23 = vadd.f32 1.0, %v2591_v17 }
 0xbb2   :  { %v1275_v20 = vadd.f32 1.0, %v2593_v19  ;;  %2131 = vmatprep.mubr.f32.mxu1 %v1277_v18 }
 0xbb3   :  { %2132 = vmatmul.mubr.f32.vlgmr.msra.gmra.mrb[16].mxu1 %v1278_v22  ;;  %v1280_v31 = vmul.f32 %v1276_v23, %v1264_v25 }
 0xbb4   :  { %v1279_v30 = vmul.f32 %v1275_v20, %v1263_v26  ;;  %2535 = vmatpush3.bf16.msra.mxu1 %v2495_v42 }
 0xbb5   :  { %2528 = vmatprep.subr.bf16.mxu1 %v2844_v44 }
 0xbb6   :  { %2134 = vmatprep.mubr.f32.mxu1 %v1279_v30 }
 0xbb7   :  { %2135 = vmatmul.mubr.f32.gmra.mrb[18].mxu1 %v1280_v31 }
 0xbb8   :  { %2536 = vmatpush3.bf16.msra.mxu1 %v2844_v44 }
 0xbb9   :  { %2529 = vmatprep.subr.bf16.mxu1 %v2503_v47 }
 0xbbc   :  { %2537 = vmatpush3.bf16.msra.mxu1 %v2503_v47 }
 0xbbd   :  { %2530 = vmatprep.subr.bf16.mxu1 %v2507_v52 }
 0xbc0   :  { %2538 = vmatpush3.bf16.msra.mxu1 %v2507_v52  ;;  %v1536_v52 = vld [vmem:[%s2880_s2 + $0x13] ss:$0 sm:$0xff] }
 0xbc1   :  { %2531 = vmatprep.subr.bf16.mxu1 %v2511_v54 }
 0xbc4   :  { %2539 = vmatpush3.bf16.msra.mxu1 %v2511_v54 }
 0xbc5   :  { %2532 = vmatprep.subr.bf16.mxu1 %v2515_v0 }
 0xbc8   :  { %2540 = vmatpush3.bf16.msra.mxu1 %v2515_v0 }
 0xbc9   :  { %2533 = vmatprep.subr.bf16.mxu1 %v2519_v36 }
 0xbcc   :  { %2541 = vmatpush3.bf16.msra.mxu1 %v2519_v36 }
 0xbcd   :  { %2534 = vmatprep.subr.bf16.mxu1 %v2523_v37 }
 0xbd0   :  { %2542 = vmatpush3.bf16.msra.mxu1 %v2523_v37 }
 0xc86   :  { %v2133_v33 = vpop.f32.mrb[16].mxu1 }
 0xc87   :  { %v1375_v27 = vadd.f32 %v2133_v33, %v1534_v28  ;;  %v1369_v38 = vpop.f32.mrb[17].mxu1 }
 0xc88   :  { %v1370_v39 = vadd.f32 %v1534_v28, %v1369_v38 }
 0xc89   :  { %v1394_v13 = vmul.f32 %v1535_v35, %v1375_v27 }
 0xc8a   :  { %v1393_v40 = vmul.f32 %v1535_v35, %v1370_v39  ;;  %v2136_v41 = vpop.f32.mrb[18].mxu1 }
 0xc8b   :  { %v1385_v32 = vadd.f32 %v2136_v41, %v1534_v28  ;;  %v1379_v42 = vpop.f32.mrb[19].mxu1  ;;  %v1398_v45 = vadd.f32 %v1394_v13, %v2795_v51 }
 0xc8c   :  { %v1380_v43 = vadd.f32 %v1534_v28, %v1379_v42  ;;  %v1397_v44 = vadd.f32 %v1393_v40, %v2792_v50 }
 0xc8d   :  { %v1396_v46 = vmul.f32 %v1535_v35, %v1385_v32 }
 0xc8e   :  { %v1395_v47 = vmul.f32 %v1535_v35, %v1380_v43  ;;  %2169 = vmatprep.mubr.f32.mxu0 %v1397_v44 }
 0xc8f   :  { %2170 = vmatmul.mubr.f32.vlgmr.msra.gmra.mrb[20].mxu0 %v1398_v45  ;;  %v1400_v49 = vadd.f32 %v1396_v46, %v2803_v55 }
 0xc90   :  { %v1399_v48 = vadd.f32 %v1395_v47, %v2800_v58 }
 0xc92   :  { %2172 = vmatprep.mubr.f32.mxu1 %v1399_v48 }
 0xc93   :  { %2173 = vmatmul.mubr.f32.vlgmr.msra.gmra.mrb[20].mxu1 %v1400_v49 }
 0xd62   :  { %v2171_v57 = vpop.f32.mrb[20].mxu0 }
 0xd63   :  { %v1495_v53 = vadd.f32 %v2171_v57, %v1536_v52  ;;  %v1489_v54 = vpop.f32.mrb[21].mxu0 }
 0xd64   :  { %v1490_v50 = vadd.f32 %v1536_v52, %v1489_v54 }
 0xd65   :  { %1509 = vst [vmem:[%s2881_s3 + $0x8] sm:$0xff] %v1495_v53 }
 0xd66   :  { %1508 = vst [vmem:[%s2881_s3] sm:$0xff] %v1490_v50  ;;  %v2174_v51 = vpop.f32.mrb[20].mxu1 }
 0xd67   :  { %v1505_v58 = vadd.f32 %v2174_v51, %v1536_v52  ;;  %v1499_v55 = vpop.f32.mrb[21].mxu1 }
 0xd68   :  { %v1500_v56 = vadd.f32 %v1536_v52, %v1499_v55 }
 0xd69   :  { %1511 = vst [vmem:[%s2881_s3 + $0x18] sm:$0xff] %v1505_v58 }
 0xd6a   :  { %1510 = vst [vmem:[%s2881_s3 + $0x10] sm:$0xff] %v1500_v56 }
 0xd6b   :  { %1516 = vsyncpa [#allocation3], 1 }

</bundles_post_ra>
